<compile_context>
chip_gen: v7x
topology: tpu7x:2x2x1
jax: 0.10.0
libtpu: 0.0.40
codegen_flags: <defaults>
</compile_context>

<pallas_src>
import functools
import math

import jax
import jax.numpy as jnp
from jax.experimental import pallas as pl
from jax.experimental.pallas import tpu as pltpu


# ----------------------------- in-kernel helpers -----------------------------

def _layer_norm(x, g, b, eps=1e-5):
    # x: (M, D) f32, g/b: (1, D) f32
    mu = jnp.mean(x, axis=-1, keepdims=True)
    xc = x - mu
    var = jnp.mean(xc * xc, axis=-1, keepdims=True)
    return xc * jax.lax.rsqrt(var + eps) * g + b


def _mha(x_q, src_bf, wqkv_ref, bqkv_ref, wo_ref, bo_ref,
         num_heads, nb, t_q, t_k, is_self):
    """Packed-QKV multi-head attention over a folded (nb * t, D) batch.

    x_q: (nb*t_q, D) f32.  src_bf: (nb*t_k, D) bf16 (cross-attention only).
    wqkv_ref block: (1, D, 3D) bf16 [Wq|Wk|Wv] with 1/sqrt(d_head) pre-folded
    into the Wq columns (and Q bias).  wo_ref block: (1, D, D) bf16.
    Returns (nb*t_q, D) f32.
    """
    d_model = wo_ref.shape[-1]
    d_head = d_model // num_heads

    xq_bf = x_q.astype(jnp.bfloat16)
    if is_self:
        # One fused QKV matmul over all nb*t_q rows.
        qkv = jnp.dot(xq_bf, wqkv_ref[0],
                      preferred_element_type=jnp.float32) + bqkv_ref[0]
        q = qkv[:, 0:d_model]
        k = qkv[:, d_model:2 * d_model]
        v = qkv[:, 2 * d_model:3 * d_model]
    else:
        q = (jnp.dot(xq_bf, wqkv_ref[0, :, 0:d_model],
                     preferred_element_type=jnp.float32)
             + bqkv_ref[0, :, 0:d_model])
        kv = (jnp.dot(src_bf, wqkv_ref[0, :, d_model:3 * d_model],
                      preferred_element_type=jnp.float32)
              + bqkv_ref[0, :, d_model:3 * d_model])
        k = kv[:, 0:d_model]
        v = kv[:, d_model:2 * d_model]

    q3 = q.reshape(nb, t_q, d_model).astype(jnp.bfloat16)
    k3 = k.reshape(nb, t_k, d_model).astype(jnp.bfloat16)
    v3 = v.reshape(nb, t_k, d_model).astype(jnp.bfloat16)

    acc = jnp.zeros((nb * t_q, d_model), jnp.float32)

    # TODO(synk): when d_head is a multiple of 128, switch this static unroll to a
    # lax.fori_loop over heads (lane-aligned dynamic slices) to hard-bound per-head
    # vreg live ranges; at sub-128 head widths dynamic lane-dim slicing does not
    # lower cleanly, so here the serial accumulation through `acc` (each head's ctx
    # is consumed immediately by its Wo partial matmul) bounds the schedule instead.
    for h in range(num_heads):
        lo, hi = h * d_head, (h + 1) * d_head
        s = jnp.einsum('bqd,bkd->bqk', q3[:, :, lo:hi], k3[:, :, lo:hi],
                       preferred_element_type=jnp.float32)      # (nb, tq, tk) f32
        s = s - jnp.max(s, axis=-1, keepdims=True)
        p = jnp.exp(s)                                          # <= 1, bf16-safe
        denom = jnp.sum(p, axis=-1, keepdims=True)              # f32 rowsum
        ctx_h = jnp.einsum('bqk,bkd->bqd', p.astype(jnp.bfloat16),
                           v3[:, :, lo:hi],
                           preferred_element_type=jnp.float32)  # (nb, tq, dh)
        # Deferred softmax normalization: scale tq*d_head elements, not tq*t_k.
        ctx_h = ctx_h * pl.reciprocal(denom, approx=True)
        # Fold this head straight into the output projection (no ctx slab, no
        # masked sub-128-lane stores).
        acc = acc + jnp.dot(
            ctx_h.reshape(nb * t_q, d_head).astype(jnp.bfloat16),
            wo_ref[0, lo:hi, :],
            preferred_element_type=jnp.float32)
    return acc + bo_ref[0]


# --------------------------------- kernel ------------------------------------

def fused_decoder_kernel(num_heads, nb, t_len, s_len,
                         tgt_ref, src_ref,
                         sa_wqkv, sa_bqkv, sa_wo, sa_bo,
                         ca_wqkv, ca_bqkv, ca_wo, ca_bo,
                         w1_ref, b1_ref, w2_ref, b2_ref,
                         lng_ref, lnb_ref,
                         out_ref):
    layer = pl.program_id(1)

    @pl.when(layer == 0)
    def _():
        out_ref[...] = tgt_ref[...]     # seed the resident running activation

    x = out_ref[...]                    # (nb*T, D) f32 running state (layer input)
    src_bf = src_ref[...]               # (nb*S, D) bf16 (cast once in the wrapper)
    lng = lng_ref[0]                    # (3, D) f32
    lnb = lnb_ref[0]                    # (3, D) f32

    # --- self attention + add & norm ---
    attn1 = _mha(x, None, sa_wqkv, sa_bqkv, sa_wo, sa_bo,
                 num_heads, nb, t_len, t_len, True)
    out1 = _layer_norm(x + attn1, lng[0:1, :], lnb[0:1, :])

    # --- cross attention + add & norm ---
    # (exp stays f32; only drop to bf16 exp on v6e/v7x if profiling shows the EUP
    #  slot binding for large S — never on v5e.)
    attn2 = _mha(out1, src_bf, ca_wqkv, ca_bqkv, ca_wo, ca_bo,
                 num_heads, nb, t_len, s_len, False)
    out2 = _layer_norm(out1 + attn2, lng[1:2, :], lnb[1:2, :])

    # --- feedforward + add & norm ---
    hid = jnp.dot(out2.astype(jnp.bfloat16), w1_ref[0],
                  preferred_element_type=jnp.float32) + b1_ref[0]
    hid = jnp.maximum(hid, 0.0)
    ffn = jnp.dot(hid.astype(jnp.bfloat16), w2_ref[0],
                  preferred_element_type=jnp.float32) + b2_ref[0]
    out_ref[...] = _layer_norm(out2 + ffn, lng[2:3, :], lnb[2:3, :])


# ----------------------------- VMEM budgeting --------------------------------

def _decoder_vmem_budget(bb, T, S, D, Dff):
    """Rough per-grid-step VMEM bytes for batch_block=bb (Python ints only)."""
    # bf16 matmul-weight block per layer: 2x packed QKV (D,3D), 2x Wo (D,D), FFN.
    w = (2 * D * 3 * D + 2 * D * D + 2 * D * Dff) * 2
    # f32 biases + LayerNorm params per layer (small).
    small = (2 * 3 * D + 2 * D + Dff + D + 2 * 3 * D) * 4
    weights = 2 * (w + small)                       # double-buffered along layer axis
    acts = (2 * bb * T * D * 4                      # 2x tgt block (f32)
            + 2 * bb * S * D * 2                    # 2x src block (bf16)
            + 2 * bb * T * D * 4)                   # 2x out block (f32)
    transient = (bb * T * 3 * D * 4                 # fused QKV result (f32)
                 + bb * S * 2 * D * 4               # cross-attn KV result (f32)
                 + bb * T * Dff * 4                 # FFN hidden (f32)
                 + 2 * bb * T * max(T, S) * 4       # per-head scores + exp (f32)
                 + 6 * bb * T * D * 4)              # residuals / LN temps / bf16 copies
    return weights + acts + transient


def _pick_batch_block(B, T, S, D, Dff, vmem_cap, min_parallel_blocks):
    """Largest divisor of B whose VMEM budget fits; honor megacore on v7x."""
    def tiling_ok(bb):
        return (((bb * T) % 8 == 0) or bb == B) and (((bb * S) % 8 == 0) or bb == B)

    divisors = [bb for bb in range(B, 0, -1) if B % bb == 0 and tiling_ok(bb)]
    budget_cap = int(0.70 * vmem_cap)
    # Pass 1: fits VMEM and leaves >= min_parallel_blocks blocks for the two TCs.
    for bb in divisors:
        if (_decoder_vmem_budget(bb, T, S, D, Dff) <= budget_cap
                and B // bb >= min_parallel_blocks):
            return bb
    # Pass 2: fits VMEM (single-core occupancy accepted, e.g. B too small).
    for bb in divisors:
        if _decoder_vmem_budget(bb, T, S, D, Dff) <= budget_cap:
            return bb
    # Fallback: smallest valid tile; rely on vmem_limit_bytes headroom.
    return divisors[-1]


# --------------------------------- wrapper ------------------------------------

def sinusoidal_pe(T, D):
    pos = jnp.arange(T, dtype=jnp.float32)[:, None]
    idx = jnp.arange(0, D, 2, dtype=jnp.float32)
    div = jnp.exp(-jnp.log(10000.0) * idx / D)
    pe = jnp.zeros((T, D), jnp.float32)
    pe = pe.at[:, 0::2].set(jnp.sin(pos * div))
    pe = pe.at[:, 1::2].set(jnp.cos(pos * div))
    return pe


@functools.partial(jax.jit, static_argnames=("num_heads", "batch_block"))
def transformer_decoder(tgt, src_nchw, params, num_heads, batch_block=None):
    B, T, D = tgt.shape
    b, c, hs, ws = src_nchw.shape
    S = hs * ws
    L = params["sa_wqkv"].shape[0]
    Dff = params["w1"].shape[-1]

    # Hardware query (trace time): VMEM capacity drives tiling; 64 MiB parts (v7x)
    # have 2 TensorCores, so prefer >= 2 parallel batch blocks there.
    try:
        vmem_cap = int(pltpu.get_tpu_info().vmem_capacity_bytes)
    except Exception:
        vmem_cap = 128 << 20
    min_parallel = 2 if vmem_cap <= (96 << 20) else 1

    bb = (_pick_batch_block(B, T, S, D, Dff, vmem_cap, min_parallel)
          if batch_block is None else batch_block)
    assert B % bb == 0
    budget = _decoder_vmem_budget(bb, T, S, D, Dff)
    vmem_limit = int(min(vmem_cap - (2 << 20), max(int(budget * 1.3), 48 << 20)))

    # src.view(b, c, h*w).transpose(1, 2) -> (B, H*W, C); cast to bf16 FIRST so the
    # transpose pass moves half the bytes and the kernel needs no per-layer cast.
    # TODO(synk): emit NHWC from the encoder to remove this transpose pass entirely.
    src2 = jnp.transpose(src_nchw.astype(jnp.bfloat16).reshape(b, c, S),
                         (0, 2, 1)).reshape(B * S, D)

    tgt = tgt + sinusoidal_pe(T, D)[None]          # with_pe == True
    tgt2 = tgt.reshape(B * T, D).astype(jnp.float32)

    def act_spec(rows):
        return pl.BlockSpec((bb * rows, D), lambda i, l: (i, 0))

    def par_spec(arr):
        nd = arr.ndim
        return pl.BlockSpec((1,) + arr.shape[1:],
                            lambda i, l, _nd=nd: (l,) + (0,) * (_nd - 1))

    p = params
    in_specs = [
        act_spec(T), act_spec(S),
        par_spec(p["sa_wqkv"]), par_spec(p["sa_bqkv"]),
        par_spec(p["sa_wo"]), par_spec(p["sa_bo"]),
        par_spec(p["ca_wqkv"]), par_spec(p["ca_bqkv"]),
        par_spec(p["ca_wo"]), par_spec(p["ca_bo"]),
        par_spec(p["w1"]), par_spec(p["b1"]),
        par_spec(p["w2"]), par_spec(p["b2"]),
        par_spec(p["ln_g"]), par_spec(p["ln_b"]),
    ]

    out = pl.pallas_call(
        functools.partial(fused_decoder_kernel, num_heads, bb, T, S),
        out_shape=jax.ShapeDtypeStruct((B * T, D), jnp.float32),
        grid_spec=pltpu.PrefetchScalarGridSpec(
            num_scalar_prefetch=0,
            grid=(B // bb, L),          # batch blocks (parallel), layers (arbitrary)
            in_specs=in_specs,
            out_specs=pl.BlockSpec((bb * T, D), lambda i, l: (i, 0)),
        ),
        compiler_params=pltpu.CompilerParams(
            dimension_semantics=("parallel", "arbitrary"),
            vmem_limit_bytes=vmem_limit),
    )(tgt2, src2,
      p["sa_wqkv"], p["sa_bqkv"], p["sa_wo"], p["sa_bo"],
      p["ca_wqkv"], p["ca_bqkv"], p["ca_wo"], p["ca_bo"],
      p["w1"], p["b1"], p["w2"], p["b2"],
      p["ln_g"], p["ln_b"])

    return out.reshape(B, T, D)


# --------------------------------- params ------------------------------------

def init_params(key, num_layers, D, Dff, num_heads):
    keys = jax.random.split(key, num_layers)
    wscale = 0.02
    d_head = D // num_heads
    q_scale = 1.0 / math.sqrt(d_head)

    def one(k):
        k1, k2, k3, k4, k5, k6 = jax.random.split(k, 6)
        sa_wqkv = wscale * jax.random.normal(k1, (D, 3 * D), jnp.float32)
        ca_wqkv = wscale * jax.random.normal(k3, (D, 3 * D), jnp.float32)
        sa_bqkv = jnp.zeros((1, 3 * D), jnp.float32)
        ca_bqkv = jnp.zeros((1, 3 * D), jnp.float32)
        # Fold 1/sqrt(d_head) into the Q columns and Q bias (one-time transform;
        # the in-kernel (M, D) scale multiply is gone).
        sa_wqkv = sa_wqkv.at[:, :D].multiply(q_scale)
        ca_wqkv = ca_wqkv.at[:, :D].multiply(q_scale)
        sa_bqkv = sa_bqkv.at[:, :D].multiply(q_scale)
        ca_bqkv = ca_bqkv.at[:, :D].multiply(q_scale)
        return {
            "sa_wqkv": sa_wqkv,
            "sa_bqkv": sa_bqkv,
            "sa_wo": wscale * jax.random.normal(k2, (D, D), jnp.float32),
            "sa_bo": jnp.zeros((1, D), jnp.float32),
            "ca_wqkv": ca_wqkv,
            "ca_bqkv": ca_bqkv,
            "ca_wo": wscale * jax.random.normal(k4, (D, D), jnp.float32),
            "ca_bo": jnp.zeros((1, D), jnp.float32),
            "w1": wscale * jax.random.normal(k5, (D, Dff), jnp.float32),
            "b1": jnp.zeros((1, Dff), jnp.float32),
            "w2": wscale * jax.random.normal(k6, (Dff, D), jnp.float32),
            "b2": jnp.zeros((1, D), jnp.float32),
            "ln_g": jnp.ones((3, D), jnp.float32),
            "ln_b": jnp.zeros((3, D), jnp.float32),
        }

    per_layer = [one(k) for k in keys]
    stacked = {k: jnp.stack([pl_[k] for pl_ in per_layer], axis=0)
               for k in per_layer[0]}
    # matmul weights in bf16 (f32 accumulation in-kernel); biases/LN stay f32.
    for name in ("sa_wqkv", "sa_wo", "ca_wqkv", "ca_wo", "w1", "w2"):
        stacked[name] = stacked[name].astype(jnp.bfloat16)
    return stacked


# ------------------------------ pure-JAX reference ----------------------------

def decoder_reference(tgt, src_nchw, params_f32, num_heads):
    """f32 reference with identical weight layout (scale already folded)."""
    B, T, D = tgt.shape
    b, c, hs, ws = src_nchw.shape
    S = hs * ws
    dh = D // num_heads
    src = jnp.transpose(src_nchw.reshape(b, c, S), (0, 2, 1)).astype(jnp.float32)
    x = tgt.astype(jnp.float32) + sinusoidal_pe(T, D)[None]
    L = params_f32["sa_wqkv"].shape[0]

    def mha(xq, xkv, wqkv, bqkv, wo, bo):
        q = xq @ wqkv[:, :D] + bqkv[0, :D]
        k = xkv @ wqkv[:, D:2 * D] + bqkv[0, D:2 * D]
        v = xkv @ wqkv[:, 2 * D:] + bqkv[0, 2 * D:]
        outs = []
        for h in range(num_heads):
            lo, hi = h * dh, (h + 1) * dh
            s = jnp.einsum('bqd,bkd->bqk', q[..., lo:hi], k[..., lo:hi])
            p = jax.nn.softmax(s, axis=-1)
            outs.append(jnp.einsum('bqk,bkd->bqd', p, v[..., lo:hi]))
        return jnp.concatenate(outs, axis=-1) @ wo + bo[0]

    def ln(y, g, beta):
        mu = y.mean(-1, keepdims=True)
        var = ((y - mu) ** 2).mean(-1, keepdims=True)
        return (y - mu) / jnp.sqrt(var + 1e-5) * g + beta

    for l in range(L):
        p = {k2: v2[l] for k2, v2 in params_f32.items()}
        a1 = mha(x, x, p["sa_wqkv"], p["sa_bqkv"], p["sa_wo"], p["sa_bo"])
        o1 = ln(x + a1, p["ln_g"][0], p["ln_b"][0])
        a2 = mha(o1, src, p["ca_wqkv"], p["ca_bqkv"], p["ca_wo"], p["ca_bo"])
        o2 = ln(o1 + a2, p["ln_g"][1], p["ln_b"][1])
        f = jnp.maximum(o2 @ p["w1"] + p["b1"][0], 0.0) @ p["w2"] + p["b2"][0]
        x = ln(o2 + f, p["ln_g"][2], p["ln_b"][2])
    return x


# --------------------------------- main --------------------------------------

if __name__ == "__main__":
    B, T, D, NHEADS, Dff = 2, 8, 32, 4, 64
    C, Hs, Ws = D, 4, 4            # src NCHW, c == d_model
    num_layers = 2

    key = jax.random.PRNGKey(0)
    k_tgt, k_src, k_par = jax.random.split(key, 3)
    tgt = jax.random.normal(k_tgt, (B, T, D), jnp.float32)
    src_nchw = jax.random.normal(k_src, (B, C, Hs, Ws), jnp.float32)

    params = init_params(k_par, num_layers, D, Dff, NHEADS)

    out = transformer_decoder(tgt, src_nchw, params, num_heads=NHEADS)
    jax.block_until_ready(out)
    assert out.shape == (B, T, D)

    # Parity vs f32 reference using the same (bf16-rounded) weights; bf16 matmuls
    # + approx reciprocal give ~1e-2-level deviations, so use a loose tolerance.
    ref = decoder_reference(
        tgt, src_nchw, {k: v.astype(jnp.float32) for k, v in params.items()},
        NHEADS)
    max_err = float(jnp.max(jnp.abs(out - ref)))
    assert max_err < 5e-2, f"parity check failed, max abs err = {max_err}"

    print("KERNEL_OK")
</pallas_src>

<mosaic_0001>
module attributes {stable_mosaic.version = 11 : i64} {
  func.func @fused_decoder_kernel(%arg0: i32, %arg1: i32, %arg2: memref<16x32xf32, #tpu.memory_space<vmem>>, %arg3: memref<32x32xbf16, #tpu.memory_space<vmem>>, %arg4: memref<1x32x96xbf16, #tpu.memory_space<vmem>>, %arg5: memref<1x1x96xf32, #tpu.memory_space<vmem>>, %arg6: memref<1x32x32xbf16, #tpu.memory_space<vmem>>, %arg7: memref<1x1x32xf32, #tpu.memory_space<vmem>>, %arg8: memref<1x32x96xbf16, #tpu.memory_space<vmem>>, %arg9: memref<1x1x96xf32, #tpu.memory_space<vmem>>, %arg10: memref<1x32x32xbf16, #tpu.memory_space<vmem>>, %arg11: memref<1x1x32xf32, #tpu.memory_space<vmem>>, %arg12: memref<1x32x64xbf16, #tpu.memory_space<vmem>>, %arg13: memref<1x1x64xf32, #tpu.memory_space<vmem>>, %arg14: memref<1x64x32xbf16, #tpu.memory_space<vmem>>, %arg15: memref<1x1x32xf32, #tpu.memory_space<vmem>>, %arg16: memref<1x3x32xf32, #tpu.memory_space<vmem>>, %arg17: memref<1x3x32xf32, #tpu.memory_space<vmem>>, %arg18: memref<16x32xf32, #tpu.memory_space<vmem>>) attributes {dimension_semantics = [#tpu.dimension_semantics<parallel>, #tpu.dimension_semantics<arbitrary>], iteration_bounds = array<i64: 1, 2>, scalar_prefetch = 0 : i64, scratch_operands = 0 : i64, tpu.core_type = #tpu.core_type<tc>, window_params = [{transform_indices = @transform_0, window_bounds = array<i64: 16, 32>}, {transform_indices = @transform_1, window_bounds = array<i64: 32, 32>}, {transform_indices = @transform_2, window_bounds = array<i64: 1, 32, 96>}, {transform_indices = @transform_3, window_bounds = array<i64: 1, 1, 96>}, {transform_indices = @transform_4, window_bounds = array<i64: 1, 32, 32>}, {transform_indices = @transform_5, window_bounds = array<i64: 1, 1, 32>}, {transform_indices = @transform_6, window_bounds = array<i64: 1, 32, 96>}, {transform_indices = @transform_7, window_bounds = array<i64: 1, 1, 96>}, {transform_indices = @transform_8, window_bounds = array<i64: 1, 32, 32>}, {transform_indices = @transform_9, window_bounds = array<i64: 1, 1, 32>}, {transform_indices = @transform_10, window_bounds = array<i64: 1, 32, 64>}, {transform_indices = @transform_11, window_bounds = array<i64: 1, 1, 64>}, {transform_indices = @transform_12, window_bounds = array<i64: 1, 64, 32>}, {transform_indices = @transform_13, window_bounds = array<i64: 1, 1, 32>}, {transform_indices = @transform_14, window_bounds = array<i64: 1, 3, 32>}, {transform_indices = @transform_15, window_bounds = array<i64: 1, 3, 32>}, {transform_indices = @transform_16, window_bounds = array<i64: 16, 32>}]} {
    %c0_i32 = arith.constant 0 : i32
    %0 = arith.cmpi eq, %arg1, %c0_i32 : i32
    %1 = arith.extui %0 : i1 to i32
    %c0_i32_0 = arith.constant 0 : i32
    %2 = arith.cmpi ne, %1, %c0_i32_0 : i32
    scf.if %2 {
      %c0_130 = arith.constant 0 : index
      %c0_131 = arith.constant 0 : index
      %323 = vector.load %arg2[%c0_130, %c0_131] : memref<16x32xf32, #tpu.memory_space<vmem>>, vector<16x32xf32>
      %c0_132 = arith.constant 0 : index
      %c0_133 = arith.constant 0 : index
      %324 = vector.load %arg18[%c0_132, %c0_133] : memref<16x32xf32, #tpu.memory_space<vmem>>, vector<16x32xf32>
      tpu.vector_store %arg18[%c0_132, %c0_133], %323 {strides = array<i32>} : memref<16x32xf32, #tpu.memory_space<vmem>>, vector<16x32xf32>,
    } else {
    }
    %c0 = arith.constant 0 : index
    %c0_1 = arith.constant 0 : index
    %3 = vector.load %arg18[%c0, %c0_1] : memref<16x32xf32, #tpu.memory_space<vmem>>, vector<16x32xf32>
    %c0_2 = arith.constant 0 : index
    %c0_3 = arith.constant 0 : index
    %4 = vector.load %arg3[%c0_2, %c0_3] : memref<32x32xbf16, #tpu.memory_space<vmem>>, vector<32x32xbf16>
    %c0_4 = arith.constant 0 : index
    %c0_5 = arith.constant 0 : index
    %c0_6 = arith.constant 0 : index
    %5 = vector.load %arg16[%c0_4, %c0_5, %c0_6] : memref<1x3x32xf32, #tpu.memory_space<vmem>>, vector<1x3x32xf32>
    %6 = vector.shape_cast %5 : vector<1x3x32xf32> to vector<3x32xf32>
    %c0_7 = arith.constant 0 : index
    %c0_8 = arith.constant 0 : index
    %c0_9 = arith.constant 0 : index
    %7 = vector.load %arg17[%c0_7, %c0_8, %c0_9] : memref<1x3x32xf32, #tpu.memory_space<vmem>>, vector<1x3x32xf32>
    %8 = vector.shape_cast %7 : vector<1x3x32xf32> to vector<3x32xf32>
    %9 = arith.truncf %3 : vector<16x32xf32> to vector<16x32xbf16>
    %c0_10 = arith.constant 0 : index
    %c0_11 = arith.constant 0 : index
    %c0_12 = arith.constant 0 : index
    %10 = vector.load %arg4[%c0_10, %c0_11, %c0_12] : memref<1x32x96xbf16, #tpu.memory_space<vmem>>, vector<1x32x96xbf16>
    %11 = vector.shape_cast %10 : vector<1x32x96xbf16> to vector<32x96xbf16>
    %cst = arith.constant dense<0.000000e+00> : vector<16x96xf32>
    %12 = tpu.matmul %9, %11, %cst {dimension_numbers = #tpu.dot_dimension_numbers<[1], [0], [0], [1], [0, 0, 1, 1], [], []>} : vector<16x32xbf16>, vector<32x96xbf16>, vector<16x96xf32> -> vector<16x96xf32>
    %c0_13 = arith.constant 0 : index
    %c0_14 = arith.constant 0 : index
    %c0_15 = arith.constant 0 : index
    %13 = vector.load %arg5[%c0_13, %c0_14, %c0_15] : memref<1x1x96xf32, #tpu.memory_space<vmem>>, vector<1x1x96xf32>
    %14 = vector.shape_cast %13 : vector<1x1x96xf32> to vector<1x96xf32>
    %15 = vector.broadcast %14 : vector<1x96xf32> to vector<16x96xf32>
    %16 = arith.addf %12, %15 : vector<16x96xf32>
    %17 = vector.extract_strided_slice %16 {offsets = [0, 0], sizes = [16, 32], strides = [1, 1]} : vector<16x96xf32> to vector<16x32xf32>
    %18 = vector.extract_strided_slice %16 {offsets = [0, 32], sizes = [16, 32], strides = [1, 1]} : vector<16x96xf32> to vector<16x32xf32>
    %19 = vector.extract_strided_slice %16 {offsets = [0, 64], sizes = [16, 32], strides = [1, 1]} : vector<16x96xf32> to vector<16x32xf32>
    %20 = vector.shape_cast %17 : vector<16x32xf32> to vector<2x8x32xf32>
    %21 = arith.truncf %20 : vector<2x8x32xf32> to vector<2x8x32xbf16>
    %22 = vector.shape_cast %18 : vector<16x32xf32> to vector<2x8x32xf32>
    %23 = arith.truncf %22 : vector<2x8x32xf32> to vector<2x8x32xbf16>
    %24 = vector.shape_cast %19 : vector<16x32xf32> to vector<2x8x32xf32>
    %25 = arith.truncf %24 : vector<2x8x32xf32> to vector<2x8x32xbf16>
    %cst_16 = arith.constant 0.000000e+00 : f32
    %26 = vector.broadcast %cst_16 : f32 to vector<16x32xf32>
    %27 = vector.extract_strided_slice %21 {offsets = [0, 0, 0], sizes = [2, 8, 8], strides = [1, 1, 1]} : vector<2x8x32xbf16> to vector<2x8x8xbf16>
    %28 = vector.extract_strided_slice %23 {offsets = [0, 0, 0], sizes = [2, 8, 8], strides = [1, 1, 1]} : vector<2x8x32xbf16> to vector<2x8x8xbf16>
    "tpu.trace_start"() <{level = 10 : i32, message = "bqd,bkd->bqk"}> : () -> ()
    %cst_17 = arith.constant dense<0.000000e+00> : vector<2x8x8xf32>
    %29 = tpu.matmul %27, %28, %cst_17 {dimension_numbers = #tpu.dot_dimension_numbers<[2], [2], [1], [1], [0, 0, 0, 1, 1, 1], [0], [0]>} : vector<2x8x8xbf16>, vector<2x8x8xbf16>, vector<2x8x8xf32> -> vector<2x8x8xf32>
    "tpu.trace_stop"() : () -> ()
    %cst_18 = arith.constant dense<0xFF800000> : vector<2x8xf32>
    %30 = vector.multi_reduction <maximumf>, %29, %cst_18 [2] : vector<2x8x8xf32> to vector<2x8xf32>
    %31 = vector.shape_cast %30 : vector<2x8xf32> to vector<2x8x1xf32>
    %32 = vector.broadcast %31 : vector<2x8x1xf32> to vector<2x8x8xf32>
    %33 = arith.subf %29, %32 : vector<2x8x8xf32>
    %34 = math.exp %33 : vector<2x8x8xf32>
    %cst_19 = arith.constant dense<0.000000e+00> : vector<2x8xf32>
    %35 = vector.multi_reduction <add>, %34, %cst_19 [2] : vector<2x8x8xf32> to vector<2x8xf32>
    %36 = vector.shape_cast %35 : vector<2x8xf32> to vector<2x8x1xf32>
    %37 = arith.truncf %34 : vector<2x8x8xf32> to vector<2x8x8xbf16>
    %38 = vector.extract_strided_slice %25 {offsets = [0, 0, 0], sizes = [2, 8, 8], strides = [1, 1, 1]} : vector<2x8x32xbf16> to vector<2x8x8xbf16>
    "tpu.trace_start"() <{level = 10 : i32, message = "bqk,bkd->bqd"}> : () -> ()
    %cst_20 = arith.constant dense<0.000000e+00> : vector<2x8x8xf32>
    %39 = tpu.matmul %37, %38, %cst_20 {dimension_numbers = #tpu.dot_dimension_numbers<[2], [1], [1], [2], [0, 0, 0, 1, 1, 2], [0], [0]>} : vector<2x8x8xbf16>, vector<2x8x8xbf16>, vector<2x8x8xf32> -> vector<2x8x8xf32>
    "tpu.trace_stop"() : () -> ()
    %40 = tpu.reciprocal %36 {approx = true} : vector<2x8x1xf32> -> vector<2x8x1xf32>
    %41 = vector.broadcast %40 : vector<2x8x1xf32> to vector<2x8x8xf32>
    %42 = arith.mulf %39, %41 : vector<2x8x8xf32>
    %43 = vector.shape_cast %42 : vector<2x8x8xf32> to vector<16x8xf32>
    %44 = arith.truncf %43 : vector<16x8xf32> to vector<16x8xbf16>
    %c0_21 = arith.constant 0 : index
    %c0_22 = arith.constant 0 : index
    %c0_23 = arith.constant 0 : index
    %45 = vector.load %arg6[%c0_21, %c0_22, %c0_23] : memref<1x32x32xbf16, #tpu.memory_space<vmem>>, vector<1x8x32xbf16>
    %46 = vector.shape_cast %45 : vector<1x8x32xbf16> to vector<8x32xbf16>
    %cst_24 = arith.constant dense<0.000000e+00> : vector<16x32xf32>
    %47 = tpu.matmul %44, %46, %cst_24 {dimension_numbers = #tpu.dot_dimension_numbers<[1], [0], [0], [1], [0, 0, 1, 1], [], []>} : vector<16x8xbf16>, vector<8x32xbf16>, vector<16x32xf32> -> vector<16x32xf32>
    %48 = arith.addf %26, %47 : vector<16x32xf32>
    %49 = vector.extract_strided_slice %21 {offsets = [0, 0, 8], sizes = [2, 8, 8], strides = [1, 1, 1]} : vector<2x8x32xbf16> to vector<2x8x8xbf16>
    %50 = vector.extract_strided_slice %23 {offsets = [0, 0, 8], sizes = [2, 8, 8], strides = [1, 1, 1]} : vector<2x8x32xbf16> to vector<2x8x8xbf16>
    "tpu.trace_start"() <{level = 10 : i32, message = "bqd,bkd->bqk"}> : () -> ()
    %cst_25 = arith.constant dense<0.000000e+00> : vector<2x8x8xf32>
    %51 = tpu.matmul %49, %50, %cst_25 {dimension_numbers = #tpu.dot_dimension_numbers<[2], [2], [1], [1], [0, 0, 0, 1, 1, 1], [0], [0]>} : vector<2x8x8xbf16>, vector<2x8x8xbf16>, vector<2x8x8xf32> -> vector<2x8x8xf32>
    "tpu.trace_stop"() : () -> ()
    %cst_26 = arith.constant dense<0xFF800000> : vector<2x8xf32>
    %52 = vector.multi_reduction <maximumf>, %51, %cst_26 [2] : vector<2x8x8xf32> to vector<2x8xf32>
    %53 = vector.shape_cast %52 : vector<2x8xf32> to vector<2x8x1xf32>
    %54 = vector.broadcast %53 : vector<2x8x1xf32> to vector<2x8x8xf32>
    %55 = arith.subf %51, %54 : vector<2x8x8xf32>
    %56 = math.exp %55 : vector<2x8x8xf32>
    %cst_27 = arith.constant dense<0.000000e+00> : vector<2x8xf32>
    %57 = vector.multi_reduction <add>, %56, %cst_27 [2] : vector<2x8x8xf32> to vector<2x8xf32>
    %58 = vector.shape_cast %57 : vector<2x8xf32> to vector<2x8x1xf32>
    %59 = arith.truncf %56 : vector<2x8x8xf32> to vector<2x8x8xbf16>
    %60 = vector.extract_strided_slice %25 {offsets = [0, 0, 8], sizes = [2, 8, 8], strides = [1, 1, 1]} : vector<2x8x32xbf16> to vector<2x8x8xbf16>
    "tpu.trace_start"() <{level = 10 : i32, message = "bqk,bkd->bqd"}> : () -> ()
    %cst_28 = arith.constant dense<0.000000e+00> : vector<2x8x8xf32>
    %61 = tpu.matmul %59, %60, %cst_28 {dimension_numbers = #tpu.dot_dimension_numbers<[2], [1], [1], [2], [0, 0, 0, 1, 1, 2], [0], [0]>} : vector<2x8x8xbf16>, vector<2x8x8xbf16>, vector<2x8x8xf32> -> vector<2x8x8xf32>
    "tpu.trace_stop"() : () -> ()
    %62 = tpu.reciprocal %58 {approx = true} : vector<2x8x1xf32> -> vector<2x8x1xf32>
    %63 = vector.broadcast %62 : vector<2x8x1xf32> to vector<2x8x8xf32>
    %64 = arith.mulf %61, %63 : vector<2x8x8xf32>
    %65 = vector.shape_cast %64 : vector<2x8x8xf32> to vector<16x8xf32>
    %66 = arith.truncf %65 : vector<16x8xf32> to vector<16x8xbf16>
    %c0_29 = arith.constant 0 : index
    %c8 = arith.constant 8 : index
    %c0_30 = arith.constant 0 : index
    %67 = vector.load %arg6[%c0_29, %c8, %c0_30] : memref<1x32x32xbf16, #tpu.memory_space<vmem>>, vector<1x8x32xbf16>
    %68 = vector.shape_cast %67 : vector<1x8x32xbf16> to vector<8x32xbf16>
    %cst_31 = arith.constant dense<0.000000e+00> : vector<16x32xf32>
    %69 = tpu.matmul %66, %68, %cst_31 {dimension_numbers = #tpu.dot_dimension_numbers<[1], [0], [0], [1], [0, 0, 1, 1], [], []>} : vector<16x8xbf16>, vector<8x32xbf16>, vector<16x32xf32> -> vector<16x32xf32>
    %70 = arith.addf %48, %69 : vector<16x32xf32>
    %71 = vector.extract_strided_slice %21 {offsets = [0, 0, 16], sizes = [2, 8, 8], strides = [1, 1, 1]} : vector<2x8x32xbf16> to vector<2x8x8xbf16>
    %72 = vector.extract_strided_slice %23 {offsets = [0, 0, 16], sizes = [2, 8, 8], strides = [1, 1, 1]} : vector<2x8x32xbf16> to vector<2x8x8xbf16>
    "tpu.trace_start"() <{level = 10 : i32, message = "bqd,bkd->bqk"}> : () -> ()
    %cst_32 = arith.constant dense<0.000000e+00> : vector<2x8x8xf32>
    %73 = tpu.matmul %71, %72, %cst_32 {dimension_numbers = #tpu.dot_dimension_numbers<[2], [2], [1], [1], [0, 0, 0, 1, 1, 1], [0], [0]>} : vector<2x8x8xbf16>, vector<2x8x8xbf16>, vector<2x8x8xf32> -> vector<2x8x8xf32>
    "tpu.trace_stop"() : () -> ()
    %cst_33 = arith.constant dense<0xFF800000> : vector<2x8xf32>
    %74 = vector.multi_reduction <maximumf>, %73, %cst_33 [2] : vector<2x8x8xf32> to vector<2x8xf32>
    %75 = vector.shape_cast %74 : vector<2x8xf32> to vector<2x8x1xf32>
    %76 = vector.broadcast %75 : vector<2x8x1xf32> to vector<2x8x8xf32>
    %77 = arith.subf %73, %76 : vector<2x8x8xf32>
    %78 = math.exp %77 : vector<2x8x8xf32>
    %cst_34 = arith.constant dense<0.000000e+00> : vector<2x8xf32>
    %79 = vector.multi_reduction <add>, %78, %cst_34 [2] : vector<2x8x8xf32> to vector<2x8xf32>
    %80 = vector.shape_cast %79 : vector<2x8xf32> to vector<2x8x1xf32>
    %81 = arith.truncf %78 : vector<2x8x8xf32> to vector<2x8x8xbf16>
    %82 = vector.extract_strided_slice %25 {offsets = [0, 0, 16], sizes = [2, 8, 8], strides = [1, 1, 1]} : vector<2x8x32xbf16> to vector<2x8x8xbf16>
    "tpu.trace_start"() <{level = 10 : i32, message = "bqk,bkd->bqd"}> : () -> ()
    %cst_35 = arith.constant dense<0.000000e+00> : vector<2x8x8xf32>
    %83 = tpu.matmul %81, %82, %cst_35 {dimension_numbers = #tpu.dot_dimension_numbers<[2], [1], [1], [2], [0, 0, 0, 1, 1, 2], [0], [0]>} : vector<2x8x8xbf16>, vector<2x8x8xbf16>, vector<2x8x8xf32> -> vector<2x8x8xf32>
    "tpu.trace_stop"() : () -> ()
    %84 = tpu.reciprocal %80 {approx = true} : vector<2x8x1xf32> -> vector<2x8x1xf32>
    %85 = vector.broadcast %84 : vector<2x8x1xf32> to vector<2x8x8xf32>
    %86 = arith.mulf %83, %85 : vector<2x8x8xf32>
    %87 = vector.shape_cast %86 : vector<2x8x8xf32> to vector<16x8xf32>
    %88 = arith.truncf %87 : vector<16x8xf32> to vector<16x8xbf16>
    %c0_36 = arith.constant 0 : index
    %c16 = arith.constant 16 : index
    %c0_37 = arith.constant 0 : index
    %89 = vector.load %arg6[%c0_36, %c16, %c0_37] : memref<1x32x32xbf16, #tpu.memory_space<vmem>>, vector<1x8x32xbf16>
    %90 = vector.shape_cast %89 : vector<1x8x32xbf16> to vector<8x32xbf16>
    %cst_38 = arith.constant dense<0.000000e+00> : vector<16x32xf32>
    %91 = tpu.matmul %88, %90, %cst_38 {dimension_numbers = #tpu.dot_dimension_numbers<[1], [0], [0], [1], [0, 0, 1, 1], [], []>} : vector<16x8xbf16>, vector<8x32xbf16>, vector<16x32xf32> -> vector<16x32xf32>
    %92 = arith.addf %70, %91 : vector<16x32xf32>
    %93 = vector.extract_strided_slice %21 {offsets = [0, 0, 24], sizes = [2, 8, 8], strides = [1, 1, 1]} : vector<2x8x32xbf16> to vector<2x8x8xbf16>
    %94 = vector.extract_strided_slice %23 {offsets = [0, 0, 24], sizes = [2, 8, 8], strides = [1, 1, 1]} : vector<2x8x32xbf16> to vector<2x8x8xbf16>
    "tpu.trace_start"() <{level = 10 : i32, message = "bqd,bkd->bqk"}> : () -> ()
    %cst_39 = arith.constant dense<0.000000e+00> : vector<2x8x8xf32>
    %95 = tpu.matmul %93, %94, %cst_39 {dimension_numbers = #tpu.dot_dimension_numbers<[2], [2], [1], [1], [0, 0, 0, 1, 1, 1], [0], [0]>} : vector<2x8x8xbf16>, vector<2x8x8xbf16>, vector<2x8x8xf32> -> vector<2x8x8xf32>
    "tpu.trace_stop"() : () -> ()
    %cst_40 = arith.constant dense<0xFF800000> : vector<2x8xf32>
    %96 = vector.multi_reduction <maximumf>, %95, %cst_40 [2] : vector<2x8x8xf32> to vector<2x8xf32>
    %97 = vector.shape_cast %96 : vector<2x8xf32> to vector<2x8x1xf32>
    %98 = vector.broadcast %97 : vector<2x8x1xf32> to vector<2x8x8xf32>
    %99 = arith.subf %95, %98 : vector<2x8x8xf32>
    %100 = math.exp %99 : vector<2x8x8xf32>
    %cst_41 = arith.constant dense<0.000000e+00> : vector<2x8xf32>
    %101 = vector.multi_reduction <add>, %100, %cst_41 [2] : vector<2x8x8xf32> to vector<2x8xf32>
    %102 = vector.shape_cast %101 : vector<2x8xf32> to vector<2x8x1xf32>
    %103 = arith.truncf %100 : vector<2x8x8xf32> to vector<2x8x8xbf16>
    %104 = vector.extract_strided_slice %25 {offsets = [0, 0, 24], sizes = [2, 8, 8], strides = [1, 1, 1]} : vector<2x8x32xbf16> to vector<2x8x8xbf16>
    "tpu.trace_start"() <{level = 10 : i32, message = "bqk,bkd->bqd"}> : () -> ()
    %cst_42 = arith.constant dense<0.000000e+00> : vector<2x8x8xf32>
    %105 = tpu.matmul %103, %104, %cst_42 {dimension_numbers = #tpu.dot_dimension_numbers<[2], [1], [1], [2], [0, 0, 0, 1, 1, 2], [0], [0]>} : vector<2x8x8xbf16>, vector<2x8x8xbf16>, vector<2x8x8xf32> -> vector<2x8x8xf32>
    "tpu.trace_stop"() : () -> ()
    %106 = tpu.reciprocal %102 {approx = true} : vector<2x8x1xf32> -> vector<2x8x1xf32>
    %107 = vector.broadcast %106 : vector<2x8x1xf32> to vector<2x8x8xf32>
    %108 = arith.mulf %105, %107 : vector<2x8x8xf32>
    %109 = vector.shape_cast %108 : vector<2x8x8xf32> to vector<16x8xf32>
    %110 = arith.truncf %109 : vector<16x8xf32> to vector<16x8xbf16>
    %c0_43 = arith.constant 0 : index
    %c24 = arith.constant 24 : index
    %c0_44 = arith.constant 0 : index
    %111 = vector.load %arg6[%c0_43, %c24, %c0_44] : memref<1x32x32xbf16, #tpu.memory_space<vmem>>, vector<1x8x32xbf16>
    %112 = vector.shape_cast %111 : vector<1x8x32xbf16> to vector<8x32xbf16>
    %cst_45 = arith.constant dense<0.000000e+00> : vector<16x32xf32>
    %113 = tpu.matmul %110, %112, %cst_45 {dimension_numbers = #tpu.dot_dimension_numbers<[1], [0], [0], [1], [0, 0, 1, 1], [], []>} : vector<16x8xbf16>, vector<8x32xbf16>, vector<16x32xf32> -> vector<16x32xf32>
    %114 = arith.addf %92, %113 : vector<16x32xf32>
    %c0_46 = arith.constant 0 : index
    %c0_47 = arith.constant 0 : index
    %c0_48 = arith.constant 0 : index
    %115 = vector.load %arg7[%c0_46, %c0_47, %c0_48] : memref<1x1x32xf32, #tpu.memory_space<vmem>>, vector<1x1x32xf32>
    %116 = vector.shape_cast %115 : vector<1x1x32xf32> to vector<1x32xf32>
    %117 = vector.broadcast %116 : vector<1x32xf32> to vector<16x32xf32>
    %118 = arith.addf %114, %117 : vector<16x32xf32>
    %119 = arith.addf %3, %118 : vector<16x32xf32>
    %120 = vector.extract_strided_slice %6 {offsets = [0, 0], sizes = [1, 32], strides = [1, 1]} : vector<3x32xf32> to vector<1x32xf32>
    %121 = vector.extract_strided_slice %8 {offsets = [0, 0], sizes = [1, 32], strides = [1, 1]} : vector<3x32xf32> to vector<1x32xf32>
    %cst_49 = arith.constant dense<0.000000e+00> : vector<16xf32>
    %122 = vector.multi_reduction <add>, %119, %cst_49 [1] : vector<16x32xf32> to vector<16xf32>
    %123 = vector.shape_cast %122 : vector<16xf32> to vector<16x1xf32>
    %cst_50 = arith.constant 3.200000e+01 : f32
    %124 = vector.broadcast %cst_50 : f32 to vector<16x1xf32>
    %125 = arith.divf %123, %124 : vector<16x1xf32>
    %126 = vector.broadcast %125 : vector<16x1xf32> to vector<16x32xf32>
    %127 = arith.subf %119, %126 : vector<16x32xf32>
    %128 = arith.mulf %127, %127 : vector<16x32xf32>
    %cst_51 = arith.constant dense<0.000000e+00> : vector<16xf32>
    %129 = vector.multi_reduction <add>, %128, %cst_51 [1] : vector<16x32xf32> to vector<16xf32>
    %130 = vector.shape_cast %129 : vector<16xf32> to vector<16x1xf32>
    %cst_52 = arith.constant 3.200000e+01 : f32
    %131 = vector.broadcast %cst_52 : f32 to vector<16x1xf32>
    %132 = arith.divf %130, %131 : vector<16x1xf32>
    %cst_53 = arith.constant 9.99999974E-6 : f32
    %133 = vector.broadcast %cst_53 : f32 to vector<16x1xf32>
    %134 = arith.addf %132, %133 : vector<16x1xf32>
    %135 = math.rsqrt %134 : vector<16x1xf32>
    %136 = vector.broadcast %135 : vector<16x1xf32> to vector<16x32xf32>
    %137 = arith.mulf %127, %136 : vector<16x32xf32>
    %138 = vector.broadcast %120 : vector<1x32xf32> to vector<16x32xf32>
    %139 = arith.mulf %137, %138 : vector<16x32xf32>
    %140 = vector.broadcast %121 : vector<1x32xf32> to vector<16x32xf32>
    %141 = arith.addf %139, %140 : vector<16x32xf32>
    %142 = arith.truncf %141 : vector<16x32xf32> to vector<16x32xbf16>
    %c0_54 = arith.constant 0 : index
    %c0_55 = arith.constant 0 : index
    %c0_56 = arith.constant 0 : index
    %143 = vector.load %arg8[%c0_54, %c0_55, %c0_56] : memref<1x32x96xbf16, #tpu.memory_space<vmem>>, vector<1x32x32xbf16>
    %144 = vector.shape_cast %143 : vector<1x32x32xbf16> to vector<32x32xbf16>
    %cst_57 = arith.constant dense<0.000000e+00> : vector<16x32xf32>
    %145 = tpu.matmul %142, %144, %cst_57 {dimension_numbers = #tpu.dot_dimension_numbers<[1], [0], [0], [1], [0, 0, 1, 1], [], []>} : vector<16x32xbf16>, vector<32x32xbf16>, vector<16x32xf32> -> vector<16x32xf32>
    %c0_58 = arith.constant 0 : index
    %c0_59 = arith.constant 0 : index
    %c0_60 = arith.constant 0 : index
    %146 = vector.load %arg9[%c0_58, %c0_59, %c0_60] : memref<1x1x96xf32, #tpu.memory_space<vmem>>, vector<1x1x32xf32>
    %147 = vector.shape_cast %146 : vector<1x1x32xf32> to vector<1x32xf32>
    %148 = vector.broadcast %147 : vector<1x32xf32> to vector<16x32xf32>
    %149 = arith.addf %145, %148 : vector<16x32xf32>
    %c0_61 = arith.constant 0 : index
    %c0_62 = arith.constant 0 : index
    %c32 = arith.constant 32 : index
    %150 = vector.load %arg8[%c0_61, %c0_62, %c32] : memref<1x32x96xbf16, #tpu.memory_space<vmem>>, vector<1x32x64xbf16>
    %151 = vector.shape_cast %150 : vector<1x32x64xbf16> to vector<32x64xbf16>
    %cst_63 = arith.constant dense<0.000000e+00> : vector<32x64xf32>
    %152 = tpu.matmul %4, %151, %cst_63 {dimension_numbers = #tpu.dot_dimension_numbers<[1], [0], [0], [1], [0, 0, 1, 1], [], []>} : vector<32x32xbf16>, vector<32x64xbf16>, vector<32x64xf32> -> vector<32x64xf32>
    %c0_64 = arith.constant 0 : index
    %c0_65 = arith.constant 0 : index
    %c32_66 = arith.constant 32 : index
    %153 = vector.load %arg9[%c0_64, %c0_65, %c32_66] : memref<1x1x96xf32, #tpu.memory_space<vmem>>, vector<1x1x64xf32>
    %154 = vector.shape_cast %153 : vector<1x1x64xf32> to vector<1x64xf32>
    %155 = vector.broadcast %154 : vector<1x64xf32> to vector<32x64xf32>
    %156 = arith.addf %152, %155 : vector<32x64xf32>
    %157 = vector.extract_strided_slice %156 {offsets = [0, 0], sizes = [32, 32], strides = [1, 1]} : vector<32x64xf32> to vector<32x32xf32>
    %158 = vector.extract_strided_slice %156 {offsets = [0, 32], sizes = [32, 32], strides = [1, 1]} : vector<32x64xf32> to vector<32x32xf32>
    %159 = vector.shape_cast %149 : vector<16x32xf32> to vector<2x8x32xf32>
    %160 = arith.truncf %159 : vector<2x8x32xf32> to vector<2x8x32xbf16>
    %161 = vector.shape_cast %157 : vector<32x32xf32> to vector<2x16x32xf32>
    %162 = arith.truncf %161 : vector<2x16x32xf32> to vector<2x16x32xbf16>
    %163 = vector.shape_cast %158 : vector<32x32xf32> to vector<2x16x32xf32>
    %164 = arith.truncf %163 : vector<2x16x32xf32> to vector<2x16x32xbf16>
    %cst_67 = arith.constant 0.000000e+00 : f32
    %165 = vector.broadcast %cst_67 : f32 to vector<16x32xf32>
    %166 = vector.extract_strided_slice %160 {offsets = [0, 0, 0], sizes = [2, 8, 8], strides = [1, 1, 1]} : vector<2x8x32xbf16> to vector<2x8x8xbf16>
    %167 = vector.extract_strided_slice %162 {offsets = [0, 0, 0], sizes = [2, 16, 8], strides = [1, 1, 1]} : vector<2x16x32xbf16> to vector<2x16x8xbf16>
    "tpu.trace_start"() <{level = 10 : i32, message = "bqd,bkd->bqk"}> : () -> ()
    %cst_68 = arith.constant dense<0.000000e+00> : vector<2x8x16xf32>
    %168 = tpu.matmul %166, %167, %cst_68 {dimension_numbers = #tpu.dot_dimension_numbers<[2], [2], [1], [1], [0, 0, 0, 1, 1, 1], [0], [0]>} : vector<2x8x8xbf16>, vector<2x16x8xbf16>, vector<2x8x16xf32> -> vector<2x8x16xf32>
    "tpu.trace_stop"() : () -> ()
    %cst_69 = arith.constant dense<0xFF800000> : vector<2x8xf32>
    %169 = vector.multi_reduction <maximumf>, %168, %cst_69 [2] : vector<2x8x16xf32> to vector<2x8xf32>
    %170 = vector.shape_cast %169 : vector<2x8xf32> to vector<2x8x1xf32>
    %171 = vector.broadcast %170 : vector<2x8x1xf32> to vector<2x8x16xf32>
    %172 = arith.subf %168, %171 : vector<2x8x16xf32>
    %173 = math.exp %172 : vector<2x8x16xf32>
    %cst_70 = arith.constant dense<0.000000e+00> : vector<2x8xf32>
    %174 = vector.multi_reduction <add>, %173, %cst_70 [2] : vector<2x8x16xf32> to vector<2x8xf32>
    %175 = vector.shape_cast %174 : vector<2x8xf32> to vector<2x8x1xf32>
    %176 = arith.truncf %173 : vector<2x8x16xf32> to vector<2x8x16xbf16>
    %177 = vector.extract_strided_slice %164 {offsets = [0, 0, 0], sizes = [2, 16, 8], strides = [1, 1, 1]} : vector<2x16x32xbf16> to vector<2x16x8xbf16>
    "tpu.trace_start"() <{level = 10 : i32, message = "bqk,bkd->bqd"}> : () -> ()
    %cst_71 = arith.constant dense<0.000000e+00> : vector<2x8x8xf32>
    %178 = tpu.matmul %176, %177, %cst_71 {dimension_numbers = #tpu.dot_dimension_numbers<[2], [1], [1], [2], [0, 0, 0, 1, 1, 2], [0], [0]>} : vector<2x8x16xbf16>, vector<2x16x8xbf16>, vector<2x8x8xf32> -> vector<2x8x8xf32>
    "tpu.trace_stop"() : () -> ()
    %179 = tpu.reciprocal %175 {approx = true} : vector<2x8x1xf32> -> vector<2x8x1xf32>
    %180 = vector.broadcast %179 : vector<2x8x1xf32> to vector<2x8x8xf32>
    %181 = arith.mulf %178, %180 : vector<2x8x8xf32>
    %182 = vector.shape_cast %181 : vector<2x8x8xf32> to vector<16x8xf32>
    %183 = arith.truncf %182 : vector<16x8xf32> to vector<16x8xbf16>
    %c0_72 = arith.constant 0 : index
    %c0_73 = arith.constant 0 : index
    %c0_74 = arith.constant 0 : index
    %184 = vector.load %arg10[%c0_72, %c0_73, %c0_74] : memref<1x32x32xbf16, #tpu.memory_space<vmem>>, vector<1x8x32xbf16>
    %185 = vector.shape_cast %184 : vector<1x8x32xbf16> to vector<8x32xbf16>
    %cst_75 = arith.constant dense<0.000000e+00> : vector<16x32xf32>
    %186 = tpu.matmul %183, %185, %cst_75 {dimension_numbers = #tpu.dot_dimension_numbers<[1], [0], [0], [1], [0, 0, 1, 1], [], []>} : vector<16x8xbf16>, vector<8x32xbf16>, vector<16x32xf32> -> vector<16x32xf32>
    %187 = arith.addf %165, %186 : vector<16x32xf32>
    %188 = vector.extract_strided_slice %160 {offsets = [0, 0, 8], sizes = [2, 8, 8], strides = [1, 1, 1]} : vector<2x8x32xbf16> to vector<2x8x8xbf16>
    %189 = vector.extract_strided_slice %162 {offsets = [0, 0, 8], sizes = [2, 16, 8], strides = [1, 1, 1]} : vector<2x16x32xbf16> to vector<2x16x8xbf16>
    "tpu.trace_start"() <{level = 10 : i32, message = "bqd,bkd->bqk"}> : () -> ()
    %cst_76 = arith.constant dense<0.000000e+00> : vector<2x8x16xf32>
    %190 = tpu.matmul %188, %189, %cst_76 {dimension_numbers = #tpu.dot_dimension_numbers<[2], [2], [1], [1], [0, 0, 0, 1, 1, 1], [0], [0]>} : vector<2x8x8xbf16>, vector<2x16x8xbf16>, vector<2x8x16xf32> -> vector<2x8x16xf32>
    "tpu.trace_stop"() : () -> ()
    %cst_77 = arith.constant dense<0xFF800000> : vector<2x8xf32>
    %191 = vector.multi_reduction <maximumf>, %190, %cst_77 [2] : vector<2x8x16xf32> to vector<2x8xf32>
    %192 = vector.shape_cast %191 : vector<2x8xf32> to vector<2x8x1xf32>
    %193 = vector.broadcast %192 : vector<2x8x1xf32> to vector<2x8x16xf32>
    %194 = arith.subf %190, %193 : vector<2x8x16xf32>
    %195 = math.exp %194 : vector<2x8x16xf32>
    %cst_78 = arith.constant dense<0.000000e+00> : vector<2x8xf32>
    %196 = vector.multi_reduction <add>, %195, %cst_78 [2] : vector<2x8x16xf32> to vector<2x8xf32>
    %197 = vector.shape_cast %196 : vector<2x8xf32> to vector<2x8x1xf32>
    %198 = arith.truncf %195 : vector<2x8x16xf32> to vector<2x8x16xbf16>
    %199 = vector.extract_strided_slice %164 {offsets = [0, 0, 8], sizes = [2, 16, 8], strides = [1, 1, 1]} : vector<2x16x32xbf16> to vector<2x16x8xbf16>
    "tpu.trace_start"() <{level = 10 : i32, message = "bqk,bkd->bqd"}> : () -> ()
    %cst_79 = arith.constant dense<0.000000e+00> : vector<2x8x8xf32>
    %200 = tpu.matmul %198, %199, %cst_79 {dimension_numbers = #tpu.dot_dimension_numbers<[2], [1], [1], [2], [0, 0, 0, 1, 1, 2], [0], [0]>} : vector<2x8x16xbf16>, vector<2x16x8xbf16>, vector<2x8x8xf32> -> vector<2x8x8xf32>
    "tpu.trace_stop"() : () -> ()
    %201 = tpu.reciprocal %197 {approx = true} : vector<2x8x1xf32> -> vector<2x8x1xf32>
    %202 = vector.broadcast %201 : vector<2x8x1xf32> to vector<2x8x8xf32>
    %203 = arith.mulf %200, %202 : vector<2x8x8xf32>
    %204 = vector.shape_cast %203 : vector<2x8x8xf32> to vector<16x8xf32>
    %205 = arith.truncf %204 : vector<16x8xf32> to vector<16x8xbf16>
    %c0_80 = arith.constant 0 : index
    %c8_81 = arith.constant 8 : index
    %c0_82 = arith.constant 0 : index
    %206 = vector.load %arg10[%c0_80, %c8_81, %c0_82] : memref<1x32x32xbf16, #tpu.memory_space<vmem>>, vector<1x8x32xbf16>
    %207 = vector.shape_cast %206 : vector<1x8x32xbf16> to vector<8x32xbf16>
    %cst_83 = arith.constant dense<0.000000e+00> : vector<16x32xf32>
    %208 = tpu.matmul %205, %207, %cst_83 {dimension_numbers = #tpu.dot_dimension_numbers<[1], [0], [0], [1], [0, 0, 1, 1], [], []>} : vector<16x8xbf16>, vector<8x32xbf16>, vector<16x32xf32> -> vector<16x32xf32>
    %209 = arith.addf %187, %208 : vector<16x32xf32>
    %210 = vector.extract_strided_slice %160 {offsets = [0, 0, 16], sizes = [2, 8, 8], strides = [1, 1, 1]} : vector<2x8x32xbf16> to vector<2x8x8xbf16>
    %211 = vector.extract_strided_slice %162 {offsets = [0, 0, 16], sizes = [2, 16, 8], strides = [1, 1, 1]} : vector<2x16x32xbf16> to vector<2x16x8xbf16>
    "tpu.trace_start"() <{level = 10 : i32, message = "bqd,bkd->bqk"}> : () -> ()
    %cst_84 = arith.constant dense<0.000000e+00> : vector<2x8x16xf32>
    %212 = tpu.matmul %210, %211, %cst_84 {dimension_numbers = #tpu.dot_dimension_numbers<[2], [2], [1], [1], [0, 0, 0, 1, 1, 1], [0], [0]>} : vector<2x8x8xbf16>, vector<2x16x8xbf16>, vector<2x8x16xf32> -> vector<2x8x16xf32>
    "tpu.trace_stop"() : () -> ()
    %cst_85 = arith.constant dense<0xFF800000> : vector<2x8xf32>
    %213 = vector.multi_reduction <maximumf>, %212, %cst_85 [2] : vector<2x8x16xf32> to vector<2x8xf32>
    %214 = vector.shape_cast %213 : vector<2x8xf32> to vector<2x8x1xf32>
    %215 = vector.broadcast %214 : vector<2x8x1xf32> to vector<2x8x16xf32>
    %216 = arith.subf %212, %215 : vector<2x8x16xf32>
    %217 = math.exp %216 : vector<2x8x16xf32>
    %cst_86 = arith.constant dense<0.000000e+00> : vector<2x8xf32>
    %218 = vector.multi_reduction <add>, %217, %cst_86 [2] : vector<2x8x16xf32> to vector<2x8xf32>
    %219 = vector.shape_cast %218 : vector<2x8xf32> to vector<2x8x1xf32>
    %220 = arith.truncf %217 : vector<2x8x16xf32> to vector<2x8x16xbf16>
    %221 = vector.extract_strided_slice %164 {offsets = [0, 0, 16], sizes = [2, 16, 8], strides = [1, 1, 1]} : vector<2x16x32xbf16> to vector<2x16x8xbf16>
    "tpu.trace_start"() <{level = 10 : i32, message = "bqk,bkd->bqd"}> : () -> ()
    %cst_87 = arith.constant dense<0.000000e+00> : vector<2x8x8xf32>
    %222 = tpu.matmul %220, %221, %cst_87 {dimension_numbers = #tpu.dot_dimension_numbers<[2], [1], [1], [2], [0, 0, 0, 1, 1, 2], [0], [0]>} : vector<2x8x16xbf16>, vector<2x16x8xbf16>, vector<2x8x8xf32> -> vector<2x8x8xf32>
    "tpu.trace_stop"() : () -> ()
    %223 = tpu.reciprocal %219 {approx = true} : vector<2x8x1xf32> -> vector<2x8x1xf32>
    %224 = vector.broadcast %223 : vector<2x8x1xf32> to vector<2x8x8xf32>
    %225 = arith.mulf %222, %224 : vector<2x8x8xf32>
    %226 = vector.shape_cast %225 : vector<2x8x8xf32> to vector<16x8xf32>
    %227 = arith.truncf %226 : vector<16x8xf32> to vector<16x8xbf16>
    %c0_88 = arith.constant 0 : index
    %c16_89 = arith.constant 16 : index
    %c0_90 = arith.constant 0 : index
    %228 = vector.load %arg10[%c0_88, %c16_89, %c0_90] : memref<1x32x32xbf16, #tpu.memory_space<vmem>>, vector<1x8x32xbf16>
    %229 = vector.shape_cast %228 : vector<1x8x32xbf16> to vector<8x32xbf16>
    %cst_91 = arith.constant dense<0.000000e+00> : vector<16x32xf32>
    %230 = tpu.matmul %227, %229, %cst_91 {dimension_numbers = #tpu.dot_dimension_numbers<[1], [0], [0], [1], [0, 0, 1, 1], [], []>} : vector<16x8xbf16>, vector<8x32xbf16>, vector<16x32xf32> -> vector<16x32xf32>
    %231 = arith.addf %209, %230 : vector<16x32xf32>
    %232 = vector.extract_strided_slice %160 {offsets = [0, 0, 24], sizes = [2, 8, 8], strides = [1, 1, 1]} : vector<2x8x32xbf16> to vector<2x8x8xbf16>
    %233 = vector.extract_strided_slice %162 {offsets = [0, 0, 24], sizes = [2, 16, 8], strides = [1, 1, 1]} : vector<2x16x32xbf16> to vector<2x16x8xbf16>
    "tpu.trace_start"() <{level = 10 : i32, message = "bqd,bkd->bqk"}> : () -> ()
    %cst_92 = arith.constant dense<0.000000e+00> : vector<2x8x16xf32>
    %234 = tpu.matmul %232, %233, %cst_92 {dimension_numbers = #tpu.dot_dimension_numbers<[2], [2], [1], [1], [0, 0, 0, 1, 1, 1], [0], [0]>} : vector<2x8x8xbf16>, vector<2x16x8xbf16>, vector<2x8x16xf32> -> vector<2x8x16xf32>
    "tpu.trace_stop"() : () -> ()
    %cst_93 = arith.constant dense<0xFF800000> : vector<2x8xf32>
    %235 = vector.multi_reduction <maximumf>, %234, %cst_93 [2] : vector<2x8x16xf32> to vector<2x8xf32>
    %236 = vector.shape_cast %235 : vector<2x8xf32> to vector<2x8x1xf32>
    %237 = vector.broadcast %236 : vector<2x8x1xf32> to vector<2x8x16xf32>
    %238 = arith.subf %234, %237 : vector<2x8x16xf32>
    %239 = math.exp %238 : vector<2x8x16xf32>
    %cst_94 = arith.constant dense<0.000000e+00> : vector<2x8xf32>
    %240 = vector.multi_reduction <add>, %239, %cst_94 [2] : vector<2x8x16xf32> to vector<2x8xf32>
    %241 = vector.shape_cast %240 : vector<2x8xf32> to vector<2x8x1xf32>
    %242 = arith.truncf %239 : vector<2x8x16xf32> to vector<2x8x16xbf16>
    %243 = vector.extract_strided_slice %164 {offsets = [0, 0, 24], sizes = [2, 16, 8], strides = [1, 1, 1]} : vector<2x16x32xbf16> to vector<2x16x8xbf16>
    "tpu.trace_start"() <{level = 10 : i32, message = "bqk,bkd->bqd"}> : () -> ()
    %cst_95 = arith.constant dense<0.000000e+00> : vector<2x8x8xf32>
    %244 = tpu.matmul %242, %243, %cst_95 {dimension_numbers = #tpu.dot_dimension_numbers<[2], [1], [1], [2], [0, 0, 0, 1, 1, 2], [0], [0]>} : vector<2x8x16xbf16>, vector<2x16x8xbf16>, vector<2x8x8xf32> -> vector<2x8x8xf32>
    "tpu.trace_stop"() : () -> ()
    %245 = tpu.reciprocal %241 {approx = true} : vector<2x8x1xf32> -> vector<2x8x1xf32>
    %246 = vector.broadcast %245 : vector<2x8x1xf32> to vector<2x8x8xf32>
    %247 = arith.mulf %244, %246 : vector<2x8x8xf32>
    %248 = vector.shape_cast %247 : vector<2x8x8xf32> to vector<16x8xf32>
    %249 = arith.truncf %248 : vector<16x8xf32> to vector<16x8xbf16>
    %c0_96 = arith.constant 0 : index
    %c24_97 = arith.constant 24 : index
    %c0_98 = arith.constant 0 : index
    %250 = vector.load %arg10[%c0_96, %c24_97, %c0_98] : memref<1x32x32xbf16, #tpu.memory_space<vmem>>, vector<1x8x32xbf16>
    %251 = vector.shape_cast %250 : vector<1x8x32xbf16> to vector<8x32xbf16>
    %cst_99 = arith.constant dense<0.000000e+00> : vector<16x32xf32>
    %252 = tpu.matmul %249, %251, %cst_99 {dimension_numbers = #tpu.dot_dimension_numbers<[1], [0], [0], [1], [0, 0, 1, 1], [], []>} : vector<16x8xbf16>, vector<8x32xbf16>, vector<16x32xf32> -> vector<16x32xf32>
    %253 = arith.addf %231, %252 : vector<16x32xf32>
    %c0_100 = arith.constant 0 : index
    %c0_101 = arith.constant 0 : index
    %c0_102 = arith.constant 0 : index
    %254 = vector.load %arg11[%c0_100, %c0_101, %c0_102] : memref<1x1x32xf32, #tpu.memory_space<vmem>>, vector<1x1x32xf32>
    %255 = vector.shape_cast %254 : vector<1x1x32xf32> to vector<1x32xf32>
    %256 = vector.broadcast %255 : vector<1x32xf32> to vector<16x32xf32>
    %257 = arith.addf %253, %256 : vector<16x32xf32>
    %258 = arith.addf %141, %257 : vector<16x32xf32>
    %259 = vector.extract_strided_slice %6 {offsets = [1, 0], sizes = [1, 32], strides = [1, 1]} : vector<3x32xf32> to vector<1x32xf32>
    %260 = vector.extract_strided_slice %8 {offsets = [1, 0], sizes = [1, 32], strides = [1, 1]} : vector<3x32xf32> to vector<1x32xf32>
    %cst_103 = arith.constant dense<0.000000e+00> : vector<16xf32>
    %261 = vector.multi_reduction <add>, %258, %cst_103 [1] : vector<16x32xf32> to vector<16xf32>
    %262 = vector.shape_cast %261 : vector<16xf32> to vector<16x1xf32>
    %cst_104 = arith.constant 3.200000e+01 : f32
    %263 = vector.broadcast %cst_104 : f32 to vector<16x1xf32>
    %264 = arith.divf %262, %263 : vector<16x1xf32>
    %265 = vector.broadcast %264 : vector<16x1xf32> to vector<16x32xf32>
    %266 = arith.subf %258, %265 : vector<16x32xf32>
    %267 = arith.mulf %266, %266 : vector<16x32xf32>
    %cst_105 = arith.constant dense<0.000000e+00> : vector<16xf32>
    %268 = vector.multi_reduction <add>, %267, %cst_105 [1] : vector<16x32xf32> to vector<16xf32>
    %269 = vector.shape_cast %268 : vector<16xf32> to vector<16x1xf32>
    %cst_106 = arith.constant 3.200000e+01 : f32
    %270 = vector.broadcast %cst_106 : f32 to vector<16x1xf32>
    %271 = arith.divf %269, %270 : vector<16x1xf32>
    %cst_107 = arith.constant 9.99999974E-6 : f32
    %272 = vector.broadcast %cst_107 : f32 to vector<16x1xf32>
    %273 = arith.addf %271, %272 : vector<16x1xf32>
    %274 = math.rsqrt %273 : vector<16x1xf32>
    %275 = vector.broadcast %274 : vector<16x1xf32> to vector<16x32xf32>
    %276 = arith.mulf %266, %275 : vector<16x32xf32>
    %277 = vector.broadcast %259 : vector<1x32xf32> to vector<16x32xf32>
    %278 = arith.mulf %276, %277 : vector<16x32xf32>
    %279 = vector.broadcast %260 : vector<1x32xf32> to vector<16x32xf32>
    %280 = arith.addf %278, %279 : vector<16x32xf32>
    %281 = arith.truncf %280 : vector<16x32xf32> to vector<16x32xbf16>
    %c0_108 = arith.constant 0 : index
    %c0_109 = arith.constant 0 : index
    %c0_110 = arith.constant 0 : index
    %282 = vector.load %arg12[%c0_108, %c0_109, %c0_110] : memref<1x32x64xbf16, #tpu.memory_space<vmem>>, vector<1x32x64xbf16>
    %283 = vector.shape_cast %282 : vector<1x32x64xbf16> to vector<32x64xbf16>
    %cst_111 = arith.constant dense<0.000000e+00> : vector<16x64xf32>
    %284 = tpu.matmul %281, %283, %cst_111 {dimension_numbers = #tpu.dot_dimension_numbers<[1], [0], [0], [1], [0, 0, 1, 1], [], []>} : vector<16x32xbf16>, vector<32x64xbf16>, vector<16x64xf32> -> vector<16x64xf32>
    %c0_112 = arith.constant 0 : index
    %c0_113 = arith.constant 0 : index
    %c0_114 = arith.constant 0 : index
    %285 = vector.load %arg13[%c0_112, %c0_113, %c0_114] : memref<1x1x64xf32, #tpu.memory_space<vmem>>, vector<1x1x64xf32>
    %286 = vector.shape_cast %285 : vector<1x1x64xf32> to vector<1x64xf32>
    %287 = vector.broadcast %286 : vector<1x64xf32> to vector<16x64xf32>
    %288 = arith.addf %284, %287 : vector<16x64xf32>
    %cst_115 = arith.constant 0.000000e+00 : f32
    %289 = vector.broadcast %cst_115 : f32 to vector<16x64xf32>
    %290 = arith.maximumf %288, %289 : vector<16x64xf32>
    %291 = arith.truncf %290 : vector<16x64xf32> to vector<16x64xbf16>
    %c0_116 = arith.constant 0 : index
    %c0_117 = arith.constant 0 : index
    %c0_118 = arith.constant 0 : index
    %292 = vector.load %arg14[%c0_116, %c0_117, %c0_118] : memref<1x64x32xbf16, #tpu.memory_space<vmem>>, vector<1x64x32xbf16>
    %293 = vector.shape_cast %292 : vector<1x64x32xbf16> to vector<64x32xbf16>
    %cst_119 = arith.constant dense<0.000000e+00> : vector<16x32xf32>
    %294 = tpu.matmul %291, %293, %cst_119 {dimension_numbers = #tpu.dot_dimension_numbers<[1], [0], [0], [1], [0, 0, 1, 1], [], []>} : vector<16x64xbf16>, vector<64x32xbf16>, vector<16x32xf32> -> vector<16x32xf32>
    %c0_120 = arith.constant 0 : index
    %c0_121 = arith.constant 0 : index
    %c0_122 = arith.constant 0 : index
    %295 = vector.load %arg15[%c0_120, %c0_121, %c0_122] : memref<1x1x32xf32, #tpu.memory_space<vmem>>, vector<1x1x32xf32>
    %296 = vector.shape_cast %295 : vector<1x1x32xf32> to vector<1x32xf32>
    %297 = vector.broadcast %296 : vector<1x32xf32> to vector<16x32xf32>
    %298 = arith.addf %294, %297 : vector<16x32xf32>
    %299 = arith.addf %280, %298 : vector<16x32xf32>
    %300 = vector.extract_strided_slice %6 {offsets = [2, 0], sizes = [1, 32], strides = [1, 1]} : vector<3x32xf32> to vector<1x32xf32>
    %301 = vector.extract_strided_slice %8 {offsets = [2, 0], sizes = [1, 32], strides = [1, 1]} : vector<3x32xf32> to vector<1x32xf32>
    %cst_123 = arith.constant dense<0.000000e+00> : vector<16xf32>
    %302 = vector.multi_reduction <add>, %299, %cst_123 [1] : vector<16x32xf32> to vector<16xf32>
    %303 = vector.shape_cast %302 : vector<16xf32> to vector<16x1xf32>
    %cst_124 = arith.constant 3.200000e+01 : f32
    %304 = vector.broadcast %cst_124 : f32 to vector<16x1xf32>
    %305 = arith.divf %303, %304 : vector<16x1xf32>
    %306 = vector.broadcast %305 : vector<16x1xf32> to vector<16x32xf32>
    %307 = arith.subf %299, %306 : vector<16x32xf32>
    %308 = arith.mulf %307, %307 : vector<16x32xf32>
    %cst_125 = arith.constant dense<0.000000e+00> : vector<16xf32>
    %309 = vector.multi_reduction <add>, %308, %cst_125 [1] : vector<16x32xf32> to vector<16xf32>
    %310 = vector.shape_cast %309 : vector<16xf32> to vector<16x1xf32>
    %cst_126 = arith.constant 3.200000e+01 : f32
    %311 = vector.broadcast %cst_126 : f32 to vector<16x1xf32>
    %312 = arith.divf %310, %311 : vector<16x1xf32>
    %cst_127 = arith.constant 9.99999974E-6 : f32
    %313 = vector.broadcast %cst_127 : f32 to vector<16x1xf32>
    %314 = arith.addf %312, %313 : vector<16x1xf32>
    %315 = math.rsqrt %314 : vector<16x1xf32>
    %316 = vector.broadcast %315 : vector<16x1xf32> to vector<16x32xf32>
    %317 = arith.mulf %307, %316 : vector<16x32xf32>
    %318 = vector.broadcast %300 : vector<1x32xf32> to vector<16x32xf32>
    %319 = arith.mulf %317, %318 : vector<16x32xf32>
    %320 = vector.broadcast %301 : vector<1x32xf32> to vector<16x32xf32>
    %321 = arith.addf %319, %320 : vector<16x32xf32>
    %c0_128 = arith.constant 0 : index
    %c0_129 = arith.constant 0 : index
    %322 = vector.load %arg18[%c0_128, %c0_129] : memref<16x32xf32, #tpu.memory_space<vmem>>, vector<16x32xf32>
    tpu.vector_store %arg18[%c0_128, %c0_129], %321 {strides = array<i32>} : memref<16x32xf32, #tpu.memory_space<vmem>>, vector<16x32xf32>,
    return
  }
  func.func @transform_0(%arg0: i32, %arg1: i32) -> (i32, i32) {
    %c0_i32 = arith.constant 0 : i32
    %c0_i32_0 = arith.constant 0 : i32
    return %arg0, %c0_i32 : i32, i32
  }
  func.func @transform_1(%arg0: i32, %arg1: i32) -> (i32, i32) {
    %c0_i32 = arith.constant 0 : i32
    %c0_i32_0 = arith.constant 0 : i32
    return %arg0, %c0_i32 : i32, i32
  }
  func.func @transform_2(%arg0: i32, %arg1: i32) -> (i32, i32, i32) {
    %c0_i32 = arith.constant 0 : i32
    %c0_i32_0 = arith.constant 0 : i32
    %c0_i32_1 = arith.constant 0 : i32
    return %arg1, %c0_i32, %c0_i32_0 : i32, i32, i32
  }
  func.func @transform_3(%arg0: i32, %arg1: i32) -> (i32, i32, i32) {
    %c0_i32 = arith.constant 0 : i32
    %c0_i32_0 = arith.constant 0 : i32
    %c0_i32_1 = arith.constant 0 : i32
    return %arg1, %c0_i32, %c0_i32_0 : i32, i32, i32
  }
  func.func @transform_4(%arg0: i32, %arg1: i32) -> (i32, i32, i32) {
    %c0_i32 = arith.constant 0 : i32
    %c0_i32_0 = arith.constant 0 : i32
    %c0_i32_1 = arith.constant 0 : i32
    return %arg1, %c0_i32, %c0_i32_0 : i32, i32, i32
  }
  func.func @transform_5(%arg0: i32, %arg1: i32) -> (i32, i32, i32) {
    %c0_i32 = arith.constant 0 : i32
    %c0_i32_0 = arith.constant 0 : i32
    %c0_i32_1 = arith.constant 0 : i32
    return %arg1, %c0_i32, %c0_i32_0 : i32, i32, i32
  }
  func.func @transform_6(%arg0: i32, %arg1: i32) -> (i32, i32, i32) {
    %c0_i32 = arith.constant 0 : i32
    %c0_i32_0 = arith.constant 0 : i32
    %c0_i32_1 = arith.constant 0 : i32
    return %arg1, %c0_i32, %c0_i32_0 : i32, i32, i32
  }
  func.func @transform_7(%arg0: i32, %arg1: i32) -> (i32, i32, i32) {
    %c0_i32 = arith.constant 0 : i32
    %c0_i32_0 = arith.constant 0 : i32
    %c0_i32_1 = arith.constant 0 : i32
    return %arg1, %c0_i32, %c0_i32_0 : i32, i32, i32
  }
  func.func @transform_8(%arg0: i32, %arg1: i32) -> (i32, i32, i32) {
    %c0_i32 = arith.constant 0 : i32
    %c0_i32_0 = arith.constant 0 : i32
    %c0_i32_1 = arith.constant 0 : i32
    return %arg1, %c0_i32, %c0_i32_0 : i32, i32, i32
  }
  func.func @transform_9(%arg0: i32, %arg1: i32) -> (i32, i32, i32) {
    %c0_i32 = arith.constant 0 : i32
    %c0_i32_0 = arith.constant 0 : i32
    %c0_i32_1 = arith.constant 0 : i32
    return %arg1, %c0_i32, %c0_i32_0 : i32, i32, i32
  }
  func.func @transform_10(%arg0: i32, %arg1: i32) -> (i32, i32, i32) {
    %c0_i32 = arith.constant 0 : i32
    %c0_i32_0 = arith.constant 0 : i32
    %c0_i32_1 = arith.constant 0 : i32
    return %arg1, %c0_i32, %c0_i32_0 : i32, i32, i32
  }
  func.func @transform_11(%arg0: i32, %arg1: i32) -> (i32, i32, i32) {
    %c0_i32 = arith.constant 0 : i32
    %c0_i32_0 = arith.constant 0 : i32
    %c0_i32_1 = arith.constant 0 : i32
    return %arg1, %c0_i32, %c0_i32_0 : i32, i32, i32
  }
  func.func @transform_12(%arg0: i32, %arg1: i32) -> (i32, i32, i32) {
    %c0_i32 = arith.constant 0 : i32
    %c0_i32_0 = arith.constant 0 : i32
    %c0_i32_1 = arith.constant 0 : i32
    return %arg1, %c0_i32, %c0_i32_0 : i32, i32, i32
  }
  func.func @transform_13(%arg0: i32, %arg1: i32) -> (i32, i32, i32) {
    %c0_i32 = arith.constant 0 : i32
    %c0_i32_0 = arith.constant 0 : i32
    %c0_i32_1 = arith.constant 0 : i32
    return %arg1, %c0_i32, %c0_i32_0 : i32, i32, i32
  }
  func.func @transform_14(%arg0: i32, %arg1: i32) -> (i32, i32, i32) {
    %c0_i32 = arith.constant 0 : i32
    %c0_i32_0 = arith.constant 0 : i32
    %c0_i32_1 = arith.constant 0 : i32
    return %arg1, %c0_i32, %c0_i32_0 : i32, i32, i32
  }
  func.func @transform_15(%arg0: i32, %arg1: i32) -> (i32, i32, i32) {
    %c0_i32 = arith.constant 0 : i32
    %c0_i32_0 = arith.constant 0 : i32
    %c0_i32_1 = arith.constant 0 : i32
    return %arg1, %c0_i32, %c0_i32_0 : i32, i32, i32
  }
  func.func @transform_16(%arg0: i32, %arg1: i32) -> (i32, i32) {
    %c0_i32 = arith.constant 0 : i32
    %c0_i32_0 = arith.constant 0 : i32
    return %arg0, %c0_i32 : i32, i32
  }
}

</mosaic_0001>

<bundles_post_ra>
// kernel: transformer_decoder.1
= control target key start
LH: loop header
LB: loop body
LE: loop exit
PB: predicated region body
PF: predicated region fallthrough
CT: control target
= control target key end

     0   :  { %s5071_s0 = inlined_call_operand.vmem [shape: f32[16,32], index: 0, kind: input, shape index: {}]   ;;  %s5072_s1 = inlined_call_operand.vmem [shape: bf16[32,32], index: 1, kind: input, shape index: {}]   ;;  %s5073_s2 = inlined_call_operand.vmem [shape: bf16[2,32,96], index: 2, kind: input, shape index: {}]   ;;  %s5074_s3 = inlined_call_operand.vmem [shape: f32[2,1,96], index: 3, kind: input, shape index: {}]   ;;  %s5075_s4 = inlined_call_operand.vmem [shape: bf16[2,32,32], index: 4, kind: input, shape index: {}]   ;;  %s5076_s5 = inlined_call_operand.vmem [shape: f32[2,1,32], index: 5, kind: input, shape index: {}]   ;;  %s5077_s6 = inlined_call_operand.vmem [shape: bf16[2,32,96], index: 6, kind: input, shape index: {}]   ;;  %s5078_s7 = inlined_call_operand.vmem [shape: f32[2,1,96], index: 7, kind: input, shape index: {}]   ;;  %s5079_s8 = inlined_call_operand.vmem [shape: bf16[2,32,32], index: 8, kind: input, shape index: {}]   ;;  %s5080_s9 = inlined_call_operand.vmem [shape: f32[2,1,32], index: 9, kind: input, shape index: {}]   ;;  %s5081_s10 = inlined_call_operand.vmem [shape: bf16[2,32,64], index: 10, kind: input, shape index: {}]   ;;  %s5082_s11 = inlined_call_operand.vmem [shape: f32[2,1,64], index: 11, kind: input, shape index: {}]   ;;  %s5083_s12 = inlined_call_operand.vmem [shape: bf16[2,64,32], index: 12, kind: input, shape index: {}]   ;;  %s5084_s13 = inlined_call_operand.vmem [shape: f32[2,1,32], index: 13, kind: input, shape index: {}]   ;;  %s5085_s14 = inlined_call_operand.vmem [shape: f32[2,3,32], index: 14, kind: input, shape index: {}]   ;;  %s5086_s15 = inlined_call_operand.vmem [shape: f32[2,3,32], index: 15, kind: input, shape index: {}]   ;;  %s5087_s16 = inlined_call_operand.hbm [shape: f32[16,32], index: 16, kind: output, shape index: {}]  }
   0x1   :  { %5094 = sst [smem:[#allocation9_spill]] %s5071_s0 }
   0x2   :  { %5095 = sst [smem:[#allocation10_spill]] %s5072_s1 }
   0x3   :  { %5096 = sst [smem:[#allocation11_spill]] %s5073_s2 }
   0x4   :  { %5097 = sst [smem:[#allocation12_spill]] %s5075_s4 }
   0x5   :  { %5098 = sst [smem:[#allocation13_spill]] %s5077_s6 }
   0x6   :  { %5099 = sst [smem:[#allocation14_spill]] %s5079_s8 }
   0x7   :  { %5100 = sst [smem:[#allocation15_spill]] %s5080_s9 }
   0x8   :  { %5101 = sst [smem:[#allocation16_spill]] %s5087_s16 }
   0x9   :  { %21 = vsyncpa [#allocation3], 0  ;;  %s4456_s21 = smov 0   ;;  %s4458_s22 = smov 0  }
   0xa   :  { %s4460_s23 = smov 0  }
   0xb LB: > { %5102 = sst [smem:[#allocation5_spill]] %s4345_s21  ;;  %s36_s25 = sadd.s32 1, %s4349_s22  ;;  %s4353_s23 = sphi %s4460_s23, %s27_s23   ;;  %s4349_s22 = sphi %s4458_s22, %s5126_s22   ;;  %s4345_s21 = sphi %s4456_s21, %s5125_s21  }
   0xc   : > { %5103 = sst [smem:[#allocation6_spill]] %s4349_s22  ;;  %p37_p0 = scmp.ge.s32.totalorder %s36_s25, 2 }
   0xd   : > { %5104 = sst [smem:[#allocation7_spill]] %s4353_s23  ;;  %p3695_p1 = scmp.ge.s32.totalorder %s4353_s23, 1 }
   0xe   : > { %p613_p2 = scmp.lt.s32.totalorder %s4353_s23, 3  ;;  %s5128_s25 = smov (%p37_p0, %s36_s25), 0 }
   0xf   : > { %5105 = sst [smem:[#allocation8_spill]] %s5128_s25 }
  0x10   : > { %p614_p3 = pnand %p3695_p1, %p613_p2 }
  0x11   : > { %p731_p4 = scmp.lt.s32.totalorder (!%p614_p3), %s4345_s21, 1  ;;  %s5106_s2 = sld [smem:[#allocation11_spill]] (!%p614_p3) }
  0x12   : > { %617 = sbr.rel (%p614_p3) target bundleno = 6777 (0x1a79), region = 84  ;;  %s5107_s4 = sld [smem:[#allocation12_spill]] (!%p614_p3) }
  0x13   : > { %s5108_s6 = sld [smem:[#allocation13_spill]] (!%p614_p3)  ;;  %s5109_s8 = sld [smem:[#allocation14_spill]] (!%p614_p3) }
  0x14   : > { %s5111_s23 = sld [smem:[#allocation5_spill]] (!%p614_p3) }
  0x19   : > { %s4479_s26 = scalar_select %p731_p4, %s4345_s21, 1 }
  0x1a   : > { %p3710_p5 = scmp.ne.s32.totalorder %s5111_s23, 0 }
  0x1b   : > { %s3779_s27 = sshll.u32 %s4479_s26, 4  ;;  %s3784_s28 = sshll.u32 %s4479_s26, 5  ;;  %vm795_vm0 = vcmask (!%p3710_p5), 261120  }
  0x1c   : > { %s735_s18 = scalar_lea.vmem %s5106_s2, %s3779_s27  ;;  %s4492_s24 = scalar_lea.vmem %s5107_s4, %s3779_s27 }
  0x1d   : > { %s4501_s21 = scalar_lea.vmem %s5108_s6, %s3779_s27  ;;  %s4510_s2 = scalar_lea.vmem %s5109_s8, %s3779_s27 }
  0x1e   : > { %s4519_s16 = scalar_lea.vmem %s5081_s10, %s3779_s27  ;;  %s770_s6 = scalar_lea.vmem %s5082_s11, %s4479_s26 }
  0x1f   : > { %s4529_s0 = scalar_lea.vmem %s5083_s12, %s3784_s28  ;;  %s778_s19 = scalar_lea.vmem %s5084_s13, %s4479_s26 }
  0x20   : > { %s3708_s20 = sshll.u32 %s4479_s26, 2  ;;  %792 = sbr.rel (%p3710_p5) target bundleno = 42 (0x2a), region = 88 }
  0x21   : > { %s4539_s27 = scalar_lea.vmem %s5085_s14, %s3708_s20  ;;  %s4544_s1 = scalar_lea.vmem %s5086_s15, %s3708_s20 }
  0x22   : > { %s5112_s29 = sld [smem:[#allocation9_spill]] (!%p3710_p5) }
  0x28   : > { %v793_v0 = vld [vmem:[%s5112_s29] sm:$0xff]  ;;  %v794_v1 = vld [vmem:[%s5112_s29 + $0x8] sm:$0xff] }
  0x29   : > { %796 = vst.msk [vmem:[#allocation2] sm:$0xff] %vm795_vm0, %v793_v0  ;;  %797 = vst.msk [vmem:[#allocation2 + $0x8] sm:$0xff] %vm795_vm0, %v794_v1 }
  0x2a PF: > { %v4213_v2 = vld [vmem:[%s735_s18] sm:$0xff]   ;;  %v4355_v3 = vmov 0.0   ;;  %v4214_v4 = vld [vmem:[%s735_s18 + $0x8] sm:$0xff]   ;;  %vm4356_vm1 = vmmov 0   ;;  %vm830_vm2 = vcmask 261120   ;;  %s5113_s18 = scalar_lea.vmem %s5074_s3, %s4479_s26  ;;  %s4357_s20 = smov 96  }
  0x2b   : > { %3883 = vmatprep.subr.bf16.mxu1 %v4355_v3  ;;  %3897 = vmatprep.subr.bf16.mxu0 %v4355_v3  ;;  %v3711_v8 = vld [vmem:[%s5113_s18] ss:$0 sm:$0xff]  ;;  %s4358_s22 = smov 64   ;;  %s4359_s25 = smov 88   ;;  %vm880_vm3 = vcmask 64512   ;;  %vm1001_vm4 = vcmask 1043456  }
  0x2c   : > { %3884 = vmatpush3.bf16.msra.mxu1 %v4213_v2  ;;  %3887 = vmatprep.mubr.msk.bf16.mxu1 %vm4356_vm1, %v4355_v3  ;;  %s4360_s23 = smov 120   ;;  %s4361_s30 = smov 56   ;;  %vm2245_vm5 = vcmask 130048   ;;  %vm3373_vm6 = vcmask 523264  }
  0x2d   : > { %3885 = vmatprep.subr.bf16.mxu1 %v4355_v3  ;;  %3899 = vmatprep.mubr.msk.bf16.mxu0 %vm4356_vm1, %v4355_v3  ;;  %s4362_s28 = smov 80   ;;  %s4363_s8 = smov 112  }
  0x2e   : > { %s4364_s17 = smov 48   ;;  %s4365_s4 = smov 72  }
  0x2f   : > { %s4366_s9 = smov 104   ;;  %s4367_s18 = smov 40  }
  0x30   : > { %v4557_v5 = vld [vmem:[#allocation2] sm:$0xff]  ;;  %v4559_v6 = vld [vmem:[#allocation2 + $0x8] sm:$0xff]  ;;  %3886 = vmatpush3.bf16.msra.mxu1 %v4214_v4 }
  0x31   : > { %v806_v7 = vpack.c.bf16 %v4559_v6, %v4557_v5  ;;  %3891 = vmatprep.subr.bf16.mxu1 %v4355_v3 }
  0x33   : > { %3888 = vmatmul.mubr.msk.bf16.vlgmr.msra.gmra.mrb[0].mxu1 %vm830_vm2, %v806_v7 }
  0x34   : > { %3893 = vmatprep.mubr.msk.bf16.mxu1 %vm4356_vm1, %v4355_v3 }
 0x106   : > { %v868_v9 = vpop.f32.mrb[0].mxu1 }
 0x107   : > { %v869_v10 = vadd.f32 %v3711_v8, %v868_v9  ;;  %v3889_v11 = vpop.f32.mrb[1].mxu1 }
 0x108   : > { %v871_v12 = vpop.f32.mrb[2].mxu1 }
 0x109   : > { %v4575_v13 = vpack.c.bf16 %v869_v10, %v869_v10  ;;  %v872_v14 = vadd.f32 %v3711_v8, %v871_v12  ;;  %v3890_v15 = vpop.f32.mrb[3].mxu1 }
 0x10b   : > { %878 = vrot.lane.b32.xlu0 %v4575_v13, %s4357_s20  ;;  %v4579_v16 = vpack.c.bf16 %v872_v14, %v872_v14 }
 0x10f   : > { %928 = vrot.lane.b32.xlu0 %v4579_v16, %s4357_s20 }
 0x113   : > { %996 = vrot.lane.b32.xlu0 %v4575_v13, %s4358_s22 }
 0x117   : > { %1101 = vrot.lane.b32.xlu0 %v4575_v13, %s4359_s25 }
 0x11b   : > { %1151 = vrot.lane.b32.xlu0 %v4579_v16, %s4359_s25 }
 0x11f   : > { %1099 = vrot.lane.b32.xlu0 %v4575_v13, %s4360_s23 }
 0x123   : > { %1149 = vrot.lane.b32.xlu0 %v4579_v16, %s4360_s23 }
 0x17d   : > { %v879_v17 = vpop.permute.xlu0 %878 }
 0x17e   : > { %v885_v18 = vsel %vm880_vm3, %v879_v17, 0 }
 0x17f   : > { %3892 = vmatpush3.bf16.xpose.msra.mxu1 %v885_v18 }
 0x180   : > { %3903 = vmatprep.subr.bf16.mxu1 %v4355_v3 }
 0x181   : > { %v929_v19 = vpop.permute.xlu0 %928 }
 0x182   : > { %v934_v20 = vsel %vm880_vm3, %v929_v19, 0 }
 0x183   : > { %3898 = vmatpush3.bf16.xpose.msra.mxu0 %v934_v20 }
 0x184   : > { %3909 = vmatprep.subr.bf16.mxu0 %v4355_v3 }
 0x185   : > { %v997_v21 = vpop.permute.xlu0 %996 }
 0x186   : > { %v1003_v22 = vsel %vm1001_vm4, %v997_v21, 0  ;;  %3894 = vmatmul.mubr.msk.bf16.vlgmr.msra.gmra.mrb[4].mxu1 %vm880_vm3, %v4575_v13 }
 0x187   : > { %3904 = vmatpush3.bf16.msra.mxu1 %v1003_v22  ;;  %3905 = vmatprep.mubr.msk.bf16.mxu1 %vm4356_vm1, %v4355_v3 }
 0x188   : > { %3915 = vmatprep.subr.bf16.mxu1 %v4355_v3 }
 0x189   : > { %v1102_v41 = vpop.permute.xlu0 %1101 }
 0x18a   : > { %3900 = vmatmul.mubr.msk.bf16.vlgmr.msra.gmra.mrb[0].mxu0 %vm880_vm3, %v4579_v16  ;;  %v1107_v45 = vsel %vm880_vm3, %v1102_v41, 0 }
 0x18b   : > { %3911 = vmatprep.mubr.msk.bf16.mxu0 %vm4356_vm1, %v4355_v3 }
 0x18d   : > { %v1152_v44 = vpop.permute.xlu0 %1151 }
 0x18e   : > { %v1157_v48 = vsel %vm880_vm3, %v1152_v44, 0 }
 0x191   : > { %v1100_v49 = vpop.permute.xlu0 %1099 }
 0x195   : > { %v1150_v50 = vpop.permute.xlu0 %1149 }
 0x259   : > { %v921_v23 = vpop.f32.mrb[4].mxu1 }
 0x25a   : > { %v3895_v24 = vpop.f32.mrb[5].mxu1  ;;  %v976_v25 = vsel %vm880_vm3, %v921_v23, -inf }
 0x25b   : > { %977 = vmax.xlane.f32.xlu1 %v976_v25  ;;  %v924_v26 = vpop.f32.mrb[6].mxu1  ;;  %v1098_v25 = vld [vmem:[%s4492_s24] sm:$0xf] }
 0x25c   : > { %v3896_v27 = vpop.f32.mrb[7].mxu1 }
 0x25d   : > { %v970_v28 = vpop.f32.mrb[0].mxu0 }
 0x25e   : > { %v3901_v29 = vpop.f32.mrb[1].mxu0  ;;  %v979_v30 = vsel %vm880_vm3, %v970_v28, -inf }
 0x25f   : > { %v973_v31 = vpop.f32.mrb[2].mxu0  ;;  %980 = vmax.xlane.f32.xlu1 %v979_v30  ;;  %v1372_v29 = vsel %vm1001_vm4, %v1098_v25, 0 }
 0x260   : > { %v3902_v32 = vpop.f32.mrb[3].mxu0 }
 0x270   : > { %1045 = vrot.lane.b32.xlu1 %v4579_v16, %s4358_s22 }
 0x2e8   : > { %v978_v33 = vpop.xlane.xlu1 %977 }
 0x2e9   : > { %v982_v34 = vsub.f32 %v921_v23, %v978_v33 }
 0x2eb   : > { %v984_v35 = vmul.f32 1.442695, %v982_v34 }
 0x2ec   : > { %v981_v36 = vpop.xlane.xlu1 %980 }
 0x2ed   : > { %4225 = vpow2.f32 %v984_v35  ;;  %v983_v37 = vsub.f32 %v970_v28, %v981_v36 }
 0x2ef   : > { %v986_v38 = vmul.f32 1.442695, %v983_v37  ;;  %v1320_v37 = vld [vmem:[%s4492_s24 + $0x4] sm:$0xf] }
 0x2f0   : > { %v1046_v39 = vpop.permute.xlu1 %1045 }
 0x2f1   : > { %4227 = vpow2.f32 %v986_v38  ;;  %v1051_v40 = vsel %vm1001_vm4, %v1046_v39, 0  ;;  %v1325_v38 = vsel %vm1001_vm4, %v1320_v37, 0 }
 0x2f2   : > { %3910 = vmatpush3.bf16.msra.mxu0 %v1051_v40 }
 0x2f3   : > { %3921 = vmatprep.subr.bf16.mxu0 %v4355_v3 }
 0x2f7   : > { %v4226_v42 = vpop.eup %4225 }
 0x2f8   : > { %v994_v43 = vpack.c.bf16 %v4226_v42, %v4226_v42  ;;  %v988_v8 = vsel %vm880_vm3, %v4226_v42, 0.0 }
 0x2fa   : > { %3906 = vmatmul.mubr.msk.bf16.vlgmr.msra.gmra.mrb[8].mxu1 %vm880_vm3, %v994_v43 }
 0x2fb   : > { %v4228_v46 = vpop.eup %4227  ;;  %3916 = vmatpush3.bf16.xpose.msra.mxu1 %v1107_v45  ;;  %3917 = vmatprep.mubr.msk.bf16.mxu1 %vm4356_vm1, %v4355_v3 }
 0x2fc   : > { %v995_v47 = vpack.c.bf16 %v4228_v46, %v4228_v46  ;;  %3927 = vmatprep.subr.bf16.mxu1 %v4355_v3  ;;  %v991_v9 = vsel %vm880_vm3, %v4228_v46, 0.0 }
 0x2fe   : > { %3912 = vmatmul.mubr.msk.bf16.vlgmr.msra.gmra.mrb[4].mxu0 %vm880_vm3, %v995_v47 }
 0x2ff   : > { %3922 = vmatpush3.bf16.xpose.msra.mxu0 %v1157_v48  ;;  %3923 = vmatprep.mubr.msk.bf16.mxu0 %vm4356_vm1, %v4355_v3 }
 0x300   : > { %3933 = vmatprep.subr.bf16.mxu0 %v4355_v3 }
 0x302   : > { %3918 = vmatmul.mubr.msk.bf16.vlgmr.msra.gmra.mrb[12].mxu1 %vm880_vm3, %v1100_v49 }
 0x303   : > { %3929 = vmatprep.mubr.msk.bf16.mxu1 %vm4356_vm1, %v4355_v3 }
 0x306   : > { %3924 = vmatmul.mubr.msk.bf16.vlgmr.msra.gmra.mrb[8].mxu0 %vm880_vm3, %v1150_v50 }
 0x307   : > { %3935 = vmatprep.mubr.msk.bf16.mxu0 %vm4356_vm1, %v4355_v3 }
 0x3cd   : > { %v4629_v51 = vpop.f32.mrb[8].mxu1 }
 0x3ce   : > { %v3907_v52 = vpop.f32.mrb[9].mxu1 }
 0x3cf   : > { %v1042_v53 = vpop.f32.mrb[10].mxu1 }
 0x3d0   : > { %v3908_v54 = vpop.f32.mrb[11].mxu1 }
 0x3d1   : > { %v4631_v55 = vpop.f32.mrb[4].mxu0 }
 0x3d2   : > { %v3913_v56 = vpop.f32.mrb[5].mxu0 }
 0x3d3   : > { %v1090_v57 = vpop.f32.mrb[6].mxu0 }
 0x3d4   : > { %v3914_v58 = vpop.f32.mrb[7].mxu0 }
 0x3d5   : > { %v1143_v59 = vpop.f32.mrb[12].mxu1 }
 0x3d6   : > { %v3919_v60 = vpop.f32.mrb[13].mxu1  ;;  %v1199_v61 = vsel %vm880_vm3, %v1143_v59, -inf }
 0x3d7   : > { %1200 = vmax.xlane.f32.xlu1 %v1199_v61  ;;  %v1146_v62 = vpop.f32.mrb[14].mxu1 }
 0x3d8   : > { %v3920_v63 = vpop.f32.mrb[15].mxu1 }
 0x3d9   : > { %v1193_v0 = vpop.f32.mrb[8].mxu0 }
 0x3da   : > { %v3925_v1 = vpop.f32.mrb[9].mxu0  ;;  %v1202_v2 = vsel %vm880_vm3, %v1193_v0, -inf }
 0x3db   : > { %1203 = vmax.xlane.f32.xlu0 %v1202_v2  ;;  %v1196_v4 = vpop.f32.mrb[10].mxu0 }
 0x3dc   : > { %v3926_v7 = vpop.f32.mrb[11].mxu0 }
 0x3e8   : > { %1267 = vrot.lane.b32.xlu1 %v4579_v16, %s4361_s30 }
 0x3f1   : > { %1219 = vrot.lane.b32.xlu0 %v4575_v13, %s4361_s30  ;;  %s5114_s30 = scalar_lea.vmem %s5076_s5, %s4479_s26 }
 0x40c   : > { %989 = vadd.xlane.f32.xlu1 %v988_v8 }
 0x410   : > { %992 = vadd.xlane.f32.xlu0 %v991_v9 }
 0x464   : > { %v1201_v10 = vpop.xlane.xlu1 %1200 }
 0x465   : > { %v1205_v11 = vsub.f32 %v1143_v59, %v1201_v10 }
 0x467   : > { %v1207_v12 = vmul.f32 1.442695, %v1205_v11 }
 0x468   : > { %v1204_v14 = vpop.xlane.xlu0 %1203  ;;  %v1268_v15 = vpop.permute.xlu1 %1267 }
 0x469   : > { %4229 = vpow2.f32 %v1207_v12  ;;  %v1206_v17 = vsub.f32 %v1193_v0, %v1204_v14  ;;  %v1273_v18 = vsel %vm1001_vm4, %v1268_v15, 0 }
 0x46a   : > { %3934 = vmatpush3.bf16.msra.mxu0 %v1273_v18 }
 0x46b   : > { %v1209_v19 = vmul.f32 1.442695, %v1206_v17  ;;  %3945 = vmatprep.subr.bf16.mxu0 %v4355_v3 }
 0x46c   : > { %v1220_v20 = vpop.permute.xlu0 %1219 }
 0x46d   : > { %4231 = vpow2.f32 %v1209_v19  ;;  %v1225_v21 = vsel %vm1001_vm4, %v1220_v20, 0 }
 0x46e   : > { %3928 = vmatpush3.bf16.msra.mxu1 %v1225_v21 }
 0x46f   : > { %3939 = vmatprep.subr.bf16.mxu1 %v4355_v3 }
 0x473   : > { %v4230_v22 = vpop.eup %4229 }
 0x474   : > { %v1211_v23 = vsel %vm880_vm3, %v4230_v22, 0.0  ;;  %v1217_v24 = vpack.c.bf16 %v4230_v22, %v4230_v22 }
 0x475   : > { %1212 = vadd.xlane.f32.xlu0 %v1211_v23 }
 0x476   : > { %3930 = vmatmul.mubr.msk.bf16.vlgmr.msra.gmra.mrb[16].mxu1 %vm880_vm3, %v1217_v24 }
 0x477   : > { %v4232_v26 = vpop.eup %4231  ;;  %3941 = vmatprep.mubr.msk.bf16.mxu1 %vm4356_vm1, %v4355_v3  ;;  %3940 = vmatpush3.bf16.msra.mxu1 %v1325_v38 }
 0x478   : > { %v1214_v27 = vsel %vm880_vm3, %v4232_v26, 0.0  ;;  %v1218_v28 = vpack.c.bf16 %v4232_v26, %v4232_v26  ;;  %3951 = vmatprep.subr.bf16.mxu1 %v4355_v3 }
 0x479   : > { %1215 = vadd.xlane.f32.xlu1 %v1214_v27 }
 0x47a   : > { %3936 = vmatmul.mubr.msk.bf16.vlgmr.msra.gmra.mrb[12].mxu0 %vm880_vm3, %v1218_v28 }
 0x47b   : > { %3946 = vmatpush3.bf16.msra.mxu0 %v1372_v29  ;;  %3947 = vmatprep.mubr.msk.bf16.mxu0 %vm4356_vm1, %v4355_v3 }
 0x47c   : > { %3957 = vmatprep.subr.bf16.mxu0 %v4355_v3 }
 0x48a   : > { %1467 = vrot.lane.b32.xlu1 %v4579_v16, %s4362_s28 }
 0x48b   : > { %1417 = vrot.lane.b32.xlu0 %v4575_v13, %s4362_s28 }
 0x48e   : > { %1415 = vrot.lane.b32.xlu1 %v4575_v13, %s4363_s8 }
 0x48f   : > { %1465 = vrot.lane.b32.xlu0 %v4579_v16, %s4363_s8 }
 0x499   : > { %v990_v30 = vpop.xlane.xlu1 %989 }
 0x49a   : > { %4233 = vrcp.f32 %v990_v30 }
 0x49d   : > { %v993_v31 = vpop.xlane.xlu0 %992 }
 0x49e   : > { %4235 = vrcp.f32 %v993_v31 }
 0x4a4   : > { %v4234_v32 = vpop.eup %4233 }
 0x4a5   : > { %v1095_v34 = vmul.f32 %v4234_v32, %v4629_v51 }
 0x4a8   : > { %v4236_v33 = vpop.eup %4235 }
 0x4a9   : > { %v1096_v35 = vmul.f32 %v4236_v33, %v4631_v55 }
 0x4ab   : > { %v1097_v36 = vpack.c.bf16 %v1096_v35, %v1095_v34 }
 0x4ad   : > { %3948 = vmatmul.mubr.msk.bf16.vlgmr.msra.gmra.mrb[16].mxu0 %vm880_vm3, %v1097_v36 }
 0x4ae   : > { %3959 = vmatprep.mubr.msk.bf16.mxu0 %vm4356_vm1, %v4355_v3 }
 0x502   : > { %v1213_v39 = vpop.xlane.xlu0 %1212 }
 0x503   : > { %4237 = vrcp.f32 %v1213_v39 }
 0x506   : > { %v1216_v40 = vpop.xlane.xlu1 %1215  ;;  %v1418_v43 = vpop.permute.xlu0 %1417 }
 0x507   : > { %4239 = vrcp.f32 %v1216_v40  ;;  %v1423_v58 = vsel %vm880_vm3, %v1418_v43, 0  ;;  %v1636_v40 = vld [vmem:[%s4492_s24 + $0x8] sm:$0xf] }
 0x50a   : > { %v1468_v41 = vpop.permute.xlu1 %1467  ;;  %v1466_v44 = vpop.permute.xlu0 %1465 }
 0x50b   : > { %v1473_v42 = vsel %vm880_vm3, %v1468_v41, 0  ;;  %v1641_v41 = vsel %vm1001_vm4, %v1636_v40, 0 }
 0x50c   : > { %3958 = vmatpush3.bf16.xpose.msra.mxu0 %v1473_v42 }
 0x50d   : > { %3969 = vmatprep.subr.bf16.mxu0 %v4355_v3  ;;  %v4238_v48 = vpop.eup %4237 }
 0x50e   : > { %v1416_v59 = vpop.permute.xlu1 %1415 }
 0x511   : > { %v4240_v50 = vpop.eup %4239 }
 0x513   : > { %3960 = vmatmul.mubr.msk.bf16.vlgmr.msra.gmra.mrb[20].mxu0 %vm880_vm3, %v1466_v44 }
 0x514   : > { %3971 = vmatprep.mubr.msk.bf16.mxu0 %vm4356_vm1, %v4355_v3 }
 0x549   : > { %v1261_v45 = vpop.f32.mrb[16].mxu1 }
 0x54a   : > { %v3931_v46 = vpop.f32.mrb[17].mxu1  ;;  %v1317_v52 = vmul.f32 %v4238_v48, %v1261_v45 }
 0x54b   : > { %v1264_v47 = vpop.f32.mrb[18].mxu1 }
 0x54c   : > { %v3932_v49 = vpop.f32.mrb[19].mxu1 }
 0x54d   : > { %v1309_v51 = vpop.f32.mrb[12].mxu0 }
 0x54e   : > { %v1318_v53 = vmul.f32 %v4240_v50, %v1309_v51  ;;  %v3937_v54 = vpop.f32.mrb[13].mxu0 }
 0x54f   : > { %v1312_v55 = vpop.f32.mrb[14].mxu0 }
 0x550   : > { %v1319_v56 = vpack.c.bf16 %v1318_v53, %v1317_v52  ;;  %v3938_v57 = vpop.f32.mrb[15].mxu0 }
 0x552   : > { %3942 = vmatmul.mubr.msk.bf16.vlgmr.msra.gmra.mrb[20].mxu1 %vm880_vm3, %v1319_v56 }
 0x553   : > { %3952 = vmatpush3.bf16.xpose.msra.mxu1 %v1423_v58  ;;  %3953 = vmatprep.mubr.msk.bf16.mxu1 %vm4356_vm1, %v4355_v3 }
 0x554   : > { %3963 = vmatprep.subr.bf16.mxu1 %v4355_v3 }
 0x55a   : > { %3954 = vmatmul.mubr.msk.bf16.vlgmr.msra.gmra.mrb[24].mxu1 %vm880_vm3, %v1416_v59 }
 0x55b   : > { %3965 = vmatprep.mubr.msk.bf16.mxu1 %vm4356_vm1, %v4355_v3 }
 0x580   : > { %v1408_v60 = vpop.f32.mrb[16].mxu0 }
 0x581   : > { %v3949_v61 = vpop.f32.mrb[17].mxu0 }
 0x582   : > { %v1411_v62 = vpop.f32.mrb[18].mxu0 }
 0x583   : > { %v3950_v63 = vpop.f32.mrb[19].mxu0 }
 0x5e6   : > { %v1509_v0 = vpop.f32.mrb[20].mxu0 }
 0x5e7   : > { %v3961_v1 = vpop.f32.mrb[21].mxu0  ;;  %v1518_v2 = vsel %vm880_vm3, %v1509_v0, -inf }
 0x5e8   : > { %1519 = vmax.xlane.f32.xlu0 %v1518_v2  ;;  %v1512_v4 = vpop.f32.mrb[22].mxu0 }
 0x5e9   : > { %v3962_v7 = vpop.f32.mrb[23].mxu0 }
 0x5fe   : > { %1535 = vrot.lane.b32.xlu0 %v4575_v13, %s4364_s17 }
 0x625   : > { %v1361_v8 = vpop.f32.mrb[20].mxu1 }
 0x626   : > { %v4685_v9 = vadd.f32 %v1408_v60, %v1361_v8  ;;  %v3943_v10 = vpop.f32.mrb[21].mxu1 }
 0x627   : > { %v1364_v11 = vpop.f32.mrb[22].mxu1 }
 0x628   : > { %v4687_v12 = vadd.f32 %v1411_v62, %v1364_v11  ;;  %v3944_v14 = vpop.f32.mrb[23].mxu1 }
 0x62d   : > { %v1459_v15 = vpop.f32.mrb[24].mxu1 }
 0x62e   : > { %v3955_v17 = vpop.f32.mrb[25].mxu1  ;;  %v1515_v18 = vsel %vm880_vm3, %v1459_v15, -inf }
 0x62f   : > { %1516 = vmax.xlane.f32.xlu1 %v1515_v18  ;;  %v1462_v19 = vpop.f32.mrb[26].mxu1 }
 0x630   : > { %v3956_v20 = vpop.f32.mrb[27].mxu1 }
 0x640   : > { %1583 = vrot.lane.b32.xlu1 %v4579_v16, %s4364_s17 }
 0x675   : > { %v1520_v21 = vpop.xlane.xlu0 %1519 }
 0x676   : > { %v1522_v22 = vsub.f32 %v1509_v0, %v1520_v21 }
 0x678   : > { %v1525_v23 = vmul.f32 1.442695, %v1522_v22 }
 0x679   : > { %v1536_v24 = vpop.permute.xlu0 %1535 }
 0x67a   : > { %4241 = vpow2.f32 %v1525_v23  ;;  %v1541_v25 = vsel %vm1001_vm4, %v1536_v24, 0 }
 0x67b   : > { %3964 = vmatpush3.bf16.msra.mxu1 %v1541_v25 }
 0x67c   : > { %3975 = vmatprep.subr.bf16.mxu1 %v4355_v3 }
 0x684   : > { %v4242_v26 = vpop.eup %4241 }
 0x685   : > { %v1530_v27 = vsel %vm880_vm3, %v4242_v26, 0.0  ;;  %v1534_v33 = vpack.c.bf16 %v4242_v26, %v4242_v26 }
 0x686   : > { %1531 = vadd.xlane.f32.xlu0 %v1530_v27 }
 0x69c   : > { %1688 = vrot.lane.b32.xlu0 %v4575_v13, %s4365_s4 }
 0x6a0   : > { %1736 = vrot.lane.b32.xlu0 %v4579_v16, %s4366_s9 }
 0x6bc   : > { %v1517_v28 = vpop.xlane.xlu1 %1516 }
 0x6bd   : > { %v1521_v29 = vsub.f32 %v1459_v15, %v1517_v28 }
 0x6bf   : > { %v1523_v30 = vmul.f32 1.442695, %v1521_v29 }
 0x6c0   : > { %v1584_v31 = vpop.permute.xlu1 %1583 }
 0x6c1   : > { %4243 = vpow2.f32 %v1523_v30  ;;  %v1589_v32 = vsel %vm1001_vm4, %v1584_v31, 0  ;;  %v1907_v31 = vld [vmem:[%s4492_s24 + $0xc] sm:$0xf] }
 0x6c2   : > { %3970 = vmatpush3.bf16.msra.mxu0 %v1589_v32  ;;  %v1912_v32 = vsel %vm1001_vm4, %v1907_v31, 0 }
 0x6c3   : > { %3981 = vmatprep.subr.bf16.mxu0 %v4355_v3 }
 0x6c5   : > { %3972 = vmatmul.mubr.msk.bf16.vlgmr.msra.gmra.mrb[24].mxu0 %vm880_vm3, %v1534_v33 }
 0x6c6   : > { %3983 = vmatprep.mubr.msk.bf16.mxu0 %vm4356_vm1, %v4355_v3 }
 0x6cb   : > { %v4244_v34 = vpop.eup %4243 }
 0x6cc   : > { %v1527_v35 = vsel %vm880_vm3, %v4244_v34, 0.0  ;;  %v1533_v36 = vpack.c.bf16 %v4244_v34, %v4244_v34 }
 0x6cd   : > { %1528 = vadd.xlane.f32.xlu1 %v1527_v35 }
 0x6ce   : > { %3966 = vmatmul.mubr.msk.bf16.vlgmr.msra.gmra.mrb[28].mxu1 %vm880_vm3, %v1533_v36 }
 0x6cf   : > { %3977 = vmatprep.mubr.msk.bf16.mxu1 %vm4356_vm1, %v4355_v3  ;;  %3976 = vmatpush3.bf16.msra.mxu1 %v1641_v41 }
 0x6d0   : > { %3987 = vmatprep.subr.bf16.mxu1 %v4355_v3 }
 0x6de   : > { %1738 = vrot.lane.b32.xlu1 %v4579_v16, %s4365_s4 }
 0x6e2   : > { %1686 = vrot.lane.b32.xlu1 %v4575_v13, %s4366_s9 }
 0x713   : > { %v1532_v37 = vpop.xlane.xlu0 %1531 }
 0x714   : > { %4245 = vrcp.f32 %v1532_v37 }
 0x717   : > { %v1689_v38 = vpop.permute.xlu0 %1688 }
 0x718   : > { %v1694_v39 = vsel %vm880_vm3, %v1689_v38, 0 }
 0x719   : > { %3982 = vmatpush3.bf16.xpose.msra.mxu0 %v1694_v39 }
 0x71a   : > { %3993 = vmatprep.subr.bf16.mxu0 %v4355_v3 }
 0x71b   : > { %v1737_v59 = vpop.permute.xlu0 %1736 }
 0x71e   : > { %v4246_v45 = vpop.eup %4245 }
 0x75a   : > { %v1529_v42 = vpop.xlane.xlu1 %1528 }
 0x75b   : > { %4247 = vrcp.f32 %v1529_v42 }
 0x75e   : > { %v1739_v43 = vpop.permute.xlu1 %1738 }
 0x75f   : > { %v1744_v58 = vsel %vm880_vm3, %v1739_v43, 0 }
 0x762   : > { %v1687_v44 = vpop.permute.xlu1 %1686 }
 0x763   : > { %3984 = vmatmul.mubr.msk.bf16.vlgmr.msra.gmra.mrb[28].mxu0 %vm880_vm3, %v1687_v44 }
 0x764   : > { %3995 = vmatprep.mubr.msk.bf16.mxu0 %vm4356_vm1, %v4355_v3 }
 0x765   : > { %v4248_v51 = vpop.eup %4247 }
 0x798   : > { %v1625_v46 = vpop.f32.mrb[24].mxu0 }
 0x799   : > { %v1634_v47 = vmul.f32 %v4246_v45, %v1625_v46  ;;  %v3973_v48 = vpop.f32.mrb[25].mxu0 }
 0x79a   : > { %v1628_v49 = vpop.f32.mrb[26].mxu0 }
 0x79b   : > { %v3974_v50 = vpop.f32.mrb[27].mxu0  ;;  %v3735_v49 = vld [vmem:[%s5114_s30] ss:$0 sm:$0xff]  ;;  %s5116_s30 = scalar_lea.vmem %s5078_s7, %s4479_s26 }
 0x7a1   : > { %v1577_v52 = vpop.f32.mrb[28].mxu1 }
 0x7a2   : > { %v1633_v53 = vmul.f32 %v4248_v51, %v1577_v52  ;;  %v3967_v54 = vpop.f32.mrb[29].mxu1 }
 0x7a3   : > { %v1580_v55 = vpop.f32.mrb[30].mxu1 }
 0x7a4   : > { %v1635_v56 = vpack.c.bf16 %v1634_v47, %v1633_v53  ;;  %v3968_v57 = vpop.f32.mrb[31].mxu1 }
 0x7a6   : > { %3978 = vmatmul.mubr.msk.bf16.vlgmr.msra.gmra.mrb[32].mxu1 %vm880_vm3, %v1635_v56 }
 0x7a7   : > { %3988 = vmatpush3.bf16.xpose.msra.mxu1 %v1744_v58  ;;  %3989 = vmatprep.mubr.msk.bf16.mxu1 %vm4356_vm1, %v4355_v3 }
 0x7a8   : > { %3999 = vmatprep.subr.bf16.mxu1 %v4355_v3 }
 0x7ae   : > { %3990 = vmatmul.mubr.msk.bf16.vlgmr.msra.gmra.mrb[36].mxu1 %vm880_vm3, %v1737_v59 }
 0x7af   : > { %4001 = vmatprep.mubr.msk.bf16.mxu1 %vm4356_vm1, %v4355_v3 }
 0x836   : > { %v1730_v60 = vpop.f32.mrb[28].mxu0 }
 0x837   : > { %v3985_v61 = vpop.f32.mrb[29].mxu0  ;;  %v1786_v62 = vsel %vm880_vm3, %v1730_v60, -inf }
 0x838   : > { %1787 = vmax.xlane.f32.xlu1 %v1786_v62  ;;  %v1733_v63 = vpop.f32.mrb[30].mxu0  ;;  %v4215_v61 = vld [vmem:[%s4501_s21] sm:$0xff]   ;;  %v4216_v62 = vld [vmem:[%s4501_s21 + $0x8] sm:$0xff]  }
 0x839   : > { %v3986_v0 = vpop.f32.mrb[31].mxu0 }
 0x849   : > { %1854 = vrot.lane.b32.xlu1 %v4579_v16, %s4367_s18 }
 0x879   : > { %v1677_v1 = vpop.f32.mrb[32].mxu1 }
 0x87a   : > { %v4730_v2 = vadd.f32 %v1677_v1, %v4685_v9  ;;  %v3979_v4 = vpop.f32.mrb[33].mxu1 }
 0x87b   : > { %v1680_v7 = vpop.f32.mrb[34].mxu1 }
 0x87c   : > { %v4733_v8 = vadd.f32 %v1680_v7, %v4687_v12  ;;  %v3980_v10 = vpop.f32.mrb[35].mxu1 }
 0x881   : > { %v1780_v11 = vpop.f32.mrb[36].mxu1 }
 0x882   : > { %v3991_v14 = vpop.f32.mrb[37].mxu1  ;;  %v1789_v15 = vsel %vm880_vm3, %v1780_v11, -inf }
 0x883   : > { %1790 = vmax.xlane.f32.xlu0 %v1789_v15  ;;  %v1783_v17 = vpop.f32.mrb[38].mxu1  ;;  %v3736_v14 = vld [vmem:[%s5116_s30] ss:$0 sm:$0xff] }
 0x884   : > { %v3992_v18 = vpop.f32.mrb[39].mxu1 }
 0x885   : > { %v1995_v18 = vlaneseq }
 0x899   : > { %1806 = vrot.lane.b32.xlu0 %v4575_v13, %s4367_s18  ;;  %s5115_s18 = sld [smem:[#allocation10_spill]] }
 0x8c5   : > { %v1788_v16 = vpop.xlane.xlu1 %1787 }
 0x8c6   : > { %v1792_v19 = vsub.f32 %v1730_v60, %v1788_v16 }
 0x8c8   : > { %v1794_v20 = vmul.f32 1.442695, %v1792_v19 }
 0x8c9   : > { %v1855_v9 = vpop.permute.xlu1 %1854 }
 0x8ca   : > { %4249 = vpow2.f32 %v1794_v20  ;;  %v1860_v21 = vsel %vm1001_vm4, %v1855_v9, 0 }
 0x8cb   : > { %4000 = vmatpush3.bf16.msra.mxu1 %v1860_v21 }
 0x8cc   : > { %4011 = vmatprep.subr.bf16.mxu1 %v4355_v3 }
 0x8d4   : > { %v4250_v12 = vpop.eup %4249 }
 0x8d5   : > { %v1798_v22 = vsel %vm880_vm3, %v4250_v12, 0.0  ;;  %v1804_v27 = vpack.c.bf16 %v4250_v12, %v4250_v12  ;;  %v4781_v12 = vshrl.u32 %v1995_v18, 7 }
 0x8d6   : > { %1799 = vadd.xlane.f32.xlu1 %v1798_v22 }
 0x910   : > { %v1791_v23 = vpop.xlane.xlu0 %1790 }
 0x911   : > { %v1793_v24 = vsub.f32 %v1780_v11, %v1791_v23  ;;  %v4217_v11 = vld [vmem:[%s5115_s18] sm:$0xff]   ;;  %v4218_v23 = vld [vmem:[%s5115_s18 + $0x8] sm:$0xff]  }
 0x913   : > { %v1796_v25 = vmul.f32 1.442695, %v1793_v24  ;;  %v1997_v24 = vsub.s32 0, %v4781_v12 }
 0x914   : > { %v1807_v26 = vpop.permute.xlu0 %1806 }
 0x915   : > { %4251 = vpow2.f32 %v1796_v25  ;;  %v1812_v13 = vsel %vm1001_vm4, %v1807_v26, 0  ;;  %v4788_v25 = vld [vmem:[%s4539_s27] sm:$0x7] }
 0x916   : > { %3994 = vmatpush3.bf16.msra.mxu0 %v1812_v13  ;;  %v1998_v26 = vrot.slane %v4788_v25, %v1997_v24 }
 0x917   : > { %4005 = vmatprep.subr.bf16.mxu0 %v4355_v3 }
 0x919   : > { %3996 = vmatmul.mubr.msk.bf16.vlgmr.msra.gmra.mrb[32].mxu0 %vm880_vm3, %v1804_v27  ;;  %v4796_v27 = vld [vmem:[%s4544_s1] sm:$0x7]  ;;  %s5117_s1 = sld [smem:[#allocation15_spill]] }
 0x91a   : > { %4007 = vmatprep.mubr.msk.bf16.mxu0 %vm4356_vm1, %v4355_v3  ;;  %4006 = vmatpush3.bf16.msra.mxu0 %v1912_v32  ;;  %v2004_v32 = vrot.slane %v4796_v27, %v1997_v24 }
 0x91f   : > { %v4252_v28 = vpop.eup %4251 }
 0x920   : > { %v1801_v29 = vsel %vm880_vm3, %v4252_v28, 0.0  ;;  %v1805_v30 = vpack.c.bf16 %v4252_v28, %v4252_v28 }
 0x921   : > { %1802 = vadd.xlane.f32.xlu0 %v1801_v29 }
 0x922   : > { %4002 = vmatmul.mubr.msk.bf16.vlgmr.msra.gmra.mrb[40].mxu1 %vm880_vm3, %v1805_v30 }
 0x923   : > { %4015 = vmatprep.mubr.msk.bf16.mxu1 %vm4356_vm1, %v4355_v3  ;;  %4012 = vmatpush3.bf16.msra.mxu1 %v4215_v61 }
 0x924   : > { %4013 = vmatprep.subr.bf16.mxu1 %v4355_v3 }
 0x927   : > { %4014 = vmatpush3.bf16.msra.mxu1 %v4216_v62 }
 0x928   : > { %4027 = vmatprep.subr.bf16.mxu1 %v4355_v3 }
 0x963   : > { %v1800_v33 = vpop.xlane.xlu1 %1799 }
 0x964   : > { %4253 = vrcp.f32 %v1800_v33 }
 0x96e   : > { %v4254_v39 = vpop.eup %4253 }
 0x9ae   : > { %v1803_v34 = vpop.xlane.xlu0 %1802 }
 0x9af   : > { %4255 = vrcp.f32 %v1803_v34 }
 0x9b9   : > { %v4256_v40 = vpop.eup %4255 }
 0x9ec   : > { %v1848_v35 = vpop.f32.mrb[32].mxu0 }
 0x9ed   : > { %v3997_v36 = vpop.f32.mrb[33].mxu0  ;;  %v1904_v42 = vmul.f32 %v4254_v39, %v1848_v35 }
 0x9ee   : > { %v1851_v37 = vpop.f32.mrb[34].mxu0 }
 0x9ef   : > { %v3998_v38 = vpop.f32.mrb[35].mxu0 }
 0x9f5   : > { %v1896_v41 = vpop.f32.mrb[40].mxu1 }
 0x9f6   : > { %v1905_v43 = vmul.f32 %v4256_v40, %v1896_v41  ;;  %v4003_v44 = vpop.f32.mrb[41].mxu1 }
 0x9f7   : > { %v1899_v45 = vpop.f32.mrb[42].mxu1 }
 0x9f8   : > { %v1906_v46 = vpack.c.bf16 %v1905_v43, %v1904_v42  ;;  %v4004_v47 = vpop.f32.mrb[43].mxu1 }
 0x9fa   : > { %4008 = vmatmul.mubr.msk.bf16.vlgmr.msra.gmra.mrb[36].mxu0 %vm880_vm3, %v1906_v46 }
 0x9fb   : > { %4023 = vmatprep.mubr.msk.bf16.mxu0 %vm830_vm2, %v4217_v11 }
 0xacd   : > { %v1948_v48 = vpop.f32.mrb[36].mxu0 }
 0xace   : > { %v1955_v50 = vadd.f32 %v1948_v48, %v4730_v2  ;;  %v4009_v51 = vpop.f32.mrb[37].mxu0 }
 0xacf   : > { %v1951_v52 = vpop.f32.mrb[38].mxu0 }
 0xad0   : > { %v1964_v53 = vadd.f32 %v3735_v49, %v1955_v50  ;;  %v1956_v54 = vadd.f32 %v1951_v52, %v4733_v8  ;;  %v4010_v55 = vpop.f32.mrb[39].mxu0 }
 0xad2   : > { %v1965_v56 = vadd.f32 %v3735_v49, %v1956_v54  ;;  %v1966_v57 = vadd.f32 %v1964_v53, %v4557_v5 }
 0xad4   : > { %v1968_v58 = vsel %vm830_vm2, %v1966_v57, 0.0  ;;  %v1967_v59 = vadd.f32 %v1965_v56, %v4559_v6 }
 0xad5   : > { %1969 = vadd.xlane.f32.xlu0 %v1968_v58 }
 0xad6   : > { %v1971_v60 = vsel %vm830_vm2, %v1967_v59, 0.0 }
 0xad7   : > { %1972 = vadd.xlane.f32.xlu1 %v1971_v60 }
 0xb62   : > { %v1970_v63 = vpop.xlane.xlu0 %1969 }
 0xb63   : > { %v1975_v0 = vmul.f32 0.03125, %v1970_v63 }
 0xb64   : > { %v1973_v5 = vpop.xlane.xlu1 %1972 }
 0xb65   : > { %v1977_v1 = vsub.f32 %v1966_v57, %v1975_v0  ;;  %v1976_v2 = vmul.f32 0.03125, %v1973_v5 }
 0xb67   : > { %v1978_v4 = vsub.f32 %v1967_v59, %v1976_v2  ;;  %v1979_v6 = vmul.f32 %v1977_v1, %v1977_v1 }
 0xb69   : > { %v1981_v7 = vsel %vm830_vm2, %v1979_v6, 0.0  ;;  %v1980_v8 = vmul.f32 %v1978_v4, %v1978_v4 }
 0xb6a   : > { %1982 = vadd.xlane.f32.xlu0 %v1981_v7 }
 0xb6b   : > { %v1984_v10 = vsel %vm830_vm2, %v1980_v8, 0.0 }
 0xb6c   : > { %1985 = vadd.xlane.f32.xlu1 %v1984_v10 }
 0xb7d   : > { %2087 = vrot.lane.b32.xlu1 %v4216_v62, %s4357_s20 }
 0xb80   : > { %2085 = vrot.lane.b32.xlu0 %v4215_v61, %s4357_s20 }
 0xb81   : > { %2091 = vrot.lane.b32.xlu1 %v3736_v14, %s4357_s20 }
 0xbf7   : > { %v1983_v15 = vpop.xlane.xlu0 %1982 }
 0xbf8   : > { %v1987_v17 = vmul.f32 0.03125, %v1983_v15 }
 0xbf9   : > { %v1986_v16 = vpop.xlane.xlu1 %1985 }
 0xbfa   : > { %v1989_v19 = vadd.f32 1e-05, %v1987_v17  ;;  %v1988_v20 = vmul.f32 0.03125, %v1986_v16 }
 0xbfb   : > { %v2086_v9 = vpop.permute.xlu0 %2085 }
 0xbfc   : > { %4257 = vrsqrt.f32 %v1989_v19  ;;  %v1990_v21 = vadd.f32 1e-05, %v1988_v20  ;;  %4019 = vmatprep.subr.bf16.mxu0 %v2086_v9 }
 0xbfd   : > { %4020 = vmatpush3.bf16.msra.mxu0 %v2086_v9  ;;  %v2088_v22 = vpop.permute.xlu1 %2087 }
 0xbfe   : > { %4259 = vrsqrt.f32 %v1990_v21  ;;  %4021 = vmatprep.subr.bf16.mxu0 %v2088_v22 }
 0xc01   : > { %4022 = vmatpush3.bf16.msra.mxu0 %v2088_v22  ;;  %v2092_v37 = vpop.permute.xlu1 %2091 }
 0xc02   : > { %4033 = vmatprep.subr.bf16.mxu0 %v4355_v3 }
 0xc04   : > { %4024 = vmatmul.mubr.msk.bf16.vlgmr.msra.gmra.mrb[40].mxu0 %vm830_vm2, %v4218_v23 }
 0xc05   : > { %4035 = vmatprep.mubr.msk.bf16.mxu0 %vm4356_vm1, %v4355_v3 }
 0xc06   : > { %v4258_v13 = vpop.eup %4257 }
 0xc07   : > { %v1993_v28 = vmul.f32 %v4258_v13, %v1977_v1 }
 0xc08   : > { %v4260_v29 = vpop.eup %4259 }
 0xc09   : > { %v1999_v30 = vmul.f32 %v1998_v26, %v1993_v28  ;;  %v1994_v31 = vmul.f32 %v4260_v29, %v1978_v4 }
 0xc0b   : > { %v2000_v33 = vmul.f32 %v1998_v26, %v1994_v31  ;;  %v4799_v34 = vadd.f32 %v2004_v32, %v1999_v30 }
 0xc0d   : > { %v4801_v35 = vadd.f32 %v2004_v32, %v2000_v33 }
 0xc0f   : > { %v2007_v36 = vpack.c.bf16 %v4801_v35, %v4799_v34 }
 0xc11   : > { %4016 = vmatmul.mubr.msk.bf16.vlgmr.msra.gmra.mrb[44].mxu1 %vm830_vm2, %v2007_v36 }
 0xc12   : > { %4029 = vmatprep.mubr.msk.bf16.mxu1 %vm4356_vm1, %v4355_v3 }
 0xcd7   : > { %v4025_v38 = vpop.f32.mrb[40].mxu0 }
 0xcd8   : > { %v2134_v39 = vpop.f32.mrb[41].mxu0  ;;  %v2143_v40 = vadd.f32 %v4025_v38, %v2092_v37 }
 0xcd9   : > { %v4026_v41 = vpop.f32.mrb[42].mxu0  ;;  %v2135_v42 = vadd.f32 %v2134_v39, %v2092_v37 }
 0xcda   : > { %v2146_v43 = vadd.f32 %v4026_v41, %v2092_v37  ;;  %v2137_v44 = vpop.f32.mrb[43].mxu0 }
 0xcdb   : > { %v2138_v45 = vadd.f32 %v2137_v44, %v2092_v37 }
 0xcdc   : > { %v4808_v46 = vpack.c.bf16 %v2146_v43, %v2143_v40 }
 0xcdd   : > { %v4810_v47 = vpack.c.bf16 %v2138_v45, %v2135_v42 }
 0xcde   : > { %2314 = vrot.lane.b32.xlu1 %v4808_v46, %s4357_s20  ;;  %v2203_v48 = vsel %vm880_vm3, %v4808_v46, 0 }
 0xcdf   : > { %2267 = vrot.lane.b32.xlu0 %v4810_v47, %s4357_s20  ;;  %v2157_v49 = vsel %vm880_vm3, %v4810_v47, 0  ;;  %4034 = vmatpush3.bf16.xpose.msra.mxu0 %v2203_v48  ;;  %s5118_s20 = scalar_lea.vmem %s5117_s1, %s4479_s26  ;;  %s4368_s26 = smov [#allocation2]  }
 0xce0   : > { %4028 = vmatpush3.bf16.xpose.msra.mxu1 %v2157_v49  ;;  %4045 = vmatprep.subr.bf16.mxu0 %v4355_v3 }
 0xce1   : > { %4039 = vmatprep.subr.bf16.mxu1 %v4355_v3 }
 0xce4   : > { %v2068_v50 = vpop.f32.mrb[44].mxu1 }
 0xce5   : > { %v2069_v51 = vadd.f32 %v3736_v14, %v2068_v50  ;;  %v4017_v52 = vpop.f32.mrb[45].mxu1 }
 0xce6   : > { %v2071_v53 = vpop.f32.mrb[46].mxu1 }
 0xce7   : > { %v4822_v54 = vpack.c.bf16 %v2069_v51, %v2069_v51  ;;  %v2072_v55 = vadd.f32 %v3736_v14, %v2071_v53  ;;  %v4018_v56 = vpop.f32.mrb[47].mxu1 }
 0xce9   : > { %v4824_v57 = vpack.c.bf16 %v2072_v55, %v2072_v55  ;;  %4030 = vmatmul.mubr.msk.bf16.vlgmr.msra.gmra.mrb[48].mxu1 %vm880_vm3, %v4822_v54 }
 0xcea   : > { %4041 = vmatprep.mubr.msk.bf16.mxu1 %vm4356_vm1, %v4355_v3 }
 0xceb   : > { %4036 = vmatmul.mubr.msk.bf16.vlgmr.msra.gmra.mrb[44].mxu0 %vm880_vm3, %v4824_v57 }
 0xcec   : > { %4047 = vmatprep.mubr.msk.bf16.mxu0 %vm4356_vm1, %v4355_v3 }
 0xd50   : > { %v2315_v58 = vpop.permute.xlu1 %2314 }
 0xd51   : > { %v2268_v59 = vpop.permute.xlu0 %2267  ;;  %4046 = vmatpush3.bf16.msra.mxu0 %v2315_v58 }
 0xd52   : > { %4040 = vmatpush3.bf16.msra.mxu1 %v2268_v59  ;;  %4057 = vmatprep.subr.bf16.mxu0 %v4355_v3 }
 0xd53   : > { %4051 = vmatprep.subr.bf16.mxu1 %v4355_v3 }
 0xdbc   : > { %v2193_v60 = vpop.f32.mrb[48].mxu1 }
 0xdbd   : > { %v4031_v61 = vpop.f32.mrb[49].mxu1  ;;  %v2246_v62 = vsel %vm2245_vm5, %v2193_v60, -inf }
 0xdbe   : > { %v2239_v63 = vpop.f32.mrb[44].mxu0  ;;  %2247 = vmax.xlane.f32.xlu0 %v2246_v62  ;;  %v2196_v0 = vpop.f32.mrb[50].mxu1  ;;  %v2365_v61 = vld [vmem:[%s4510_s2] sm:$0xf] }
 0xdbf   : > { %v4032_v5 = vpop.f32.mrb[51].mxu1  ;;  %v4037_v1 = vpop.f32.mrb[45].mxu0  ;;  %v2249_v2 = vsel %vm2245_vm5, %v2239_v63, -inf }
 0xdc0   : > { %2250 = vmax.xlane.f32.xlu1 %v2249_v2  ;;  %v2242_v4 = vpop.f32.mrb[46].mxu0  ;;  %v2637_v1 = vsel %vm1001_vm4, %v2365_v61, 0 }
 0xdc1   : > { %v4038_v6 = vpop.f32.mrb[47].mxu0  ;;  %v2585_v4 = vld [vmem:[%s4510_s2 + $0x4] sm:$0xf] }
 0xdc2   : > { %v2590_v6 = vsel %vm1001_vm4, %v2585_v4, 0 }
 0xdd1   : > { %2420 = vrot.lane.b32.xlu1 %v4808_v46, %s4360_s23 }
 0xdd4   : > { %2369 = vrot.lane.b32.xlu0 %v4810_v47, %s4360_s23 }
 0xdd5   : > { %2418 = vrot.lane.b32.xlu1 %v4824_v57, %s4360_s23 }
 0xdd8   : > { %2367 = vrot.lane.b32.xlu0 %v4822_v54, %s4360_s23 }
 0xe4b   : > { %v2248_v7 = vpop.xlane.xlu0 %2247 }
 0xe4c   : > { %v2252_v8 = vsub.f32 %v2193_v60, %v2248_v7 }
 0xe4d   : > { %v2251_v10 = vpop.xlane.xlu1 %2250 }
 0xe4e   : > { %v2254_v11 = vmul.f32 1.442695, %v2252_v8  ;;  %v2253_v14 = vsub.f32 %v2239_v63, %v2251_v10 }
 0xe4f   : > { %v2370_v18 = vpop.permute.xlu0 %2369 }
 0xe50   : > { %4261 = vpow2.f32 %v2254_v11  ;;  %v2256_v15 = vmul.f32 1.442695, %v2253_v14  ;;  %v2375_v9 = vsel %vm880_vm3, %v2370_v18, 0 }
 0xe51   : > { %v2421_v20 = vpop.permute.xlu1 %2420 }
 0xe52   : > { %4263 = vpow2.f32 %v2256_v15  ;;  %v2426_v22 = vsel %vm880_vm3, %v2421_v20, 0 }
 0xe53   : > { %v2368_v23 = vpop.permute.xlu0 %2367 }
 0xe55   : > { %v2419_v24 = vpop.permute.xlu1 %2418 }
 0xe5a   : > { %v4262_v17 = vpop.eup %4261 }
 0xe5b   : > { %v2264_v16 = vpack.c.bf16 %v4262_v17, %v4262_v17  ;;  %v2258_v48 = vsel %vm2245_vm5, %v4262_v17, 0.0 }
 0xe5c   : > { %v4264_v19 = vpop.eup %4263 }
 0xe5d   : > { %4042 = vmatmul.mubr.msk.bf16.vlgmr.msra.gmra.mrb[52].mxu1 %vm2245_vm5, %v2264_v16  ;;  %v2265_v21 = vpack.c.bf16 %v4264_v19, %v4264_v19  ;;  %v2261_v49 = vsel %vm2245_vm5, %v4264_v19, 0.0 }
 0xe5e   : > { %4052 = vmatpush3.bf16.xpose.msra.mxu1 %v2375_v9  ;;  %4053 = vmatprep.mubr.msk.bf16.mxu1 %vm4356_vm1, %v4355_v3 }
 0xe5f   : > { %4048 = vmatmul.mubr.msk.bf16.vlgmr.msra.gmra.mrb[48].mxu0 %vm2245_vm5, %v2265_v21  ;;  %4063 = vmatprep.subr.bf16.mxu1 %v4355_v3 }
 0xe60   : > { %4058 = vmatpush3.bf16.xpose.msra.mxu0 %v2426_v22  ;;  %4059 = vmatprep.mubr.msk.bf16.mxu0 %vm4356_vm1, %v4355_v3 }
 0xe61   : > { %4069 = vmatprep.subr.bf16.mxu0 %v4355_v3 }
 0xe65   : > { %4054 = vmatmul.mubr.msk.bf16.vlgmr.msra.gmra.mrb[56].mxu1 %vm880_vm3, %v2368_v23 }
 0xe66   : > { %4065 = vmatprep.mubr.msk.bf16.mxu1 %vm4356_vm1, %v4355_v3 }
 0xe67   : > { %4060 = vmatmul.mubr.msk.bf16.vlgmr.msra.gmra.mrb[52].mxu0 %vm880_vm3, %v2419_v24 }
 0xe68   : > { %4071 = vmatprep.mubr.msk.bf16.mxu0 %vm4356_vm1, %v4355_v3 }
 0xf30   : > { %v4862_v26 = vpop.f32.mrb[52].mxu1 }
 0xf31   : > { %v4043_v13 = vpop.f32.mrb[53].mxu1 }
 0xf32   : > { %v2310_v28 = vpop.f32.mrb[54].mxu1  ;;  %v4864_v29 = vpop.f32.mrb[48].mxu0 }
 0xf33   : > { %v4044_v30 = vpop.f32.mrb[55].mxu1  ;;  %v4049_v31 = vpop.f32.mrb[49].mxu0 }
 0xf34   : > { %v2357_v32 = vpop.f32.mrb[50].mxu0 }
 0xf35   : > { %v4050_v33 = vpop.f32.mrb[51].mxu0 }
 0xf38   : > { %v2411_v36 = vpop.f32.mrb[56].mxu1 }
 0xf39   : > { %v4055_v37 = vpop.f32.mrb[57].mxu1  ;;  %v2468_v38 = vsel %vm2245_vm5, %v2411_v36, -inf }
 0xf3a   : > { %v2462_v39 = vpop.f32.mrb[52].mxu0  ;;  %2469 = vmax.xlane.f32.xlu0 %v2468_v38  ;;  %v2414_v40 = vpop.f32.mrb[58].mxu1 }
 0xf3b   : > { %v4056_v41 = vpop.f32.mrb[59].mxu1  ;;  %v4061_v42 = vpop.f32.mrb[53].mxu0  ;;  %v2471_v43 = vsel %vm2245_vm5, %v2462_v39, -inf }
 0xf3c   : > { %2472 = vmax.xlane.f32.xlu1 %v2471_v43  ;;  %v2465_v44 = vpop.f32.mrb[54].mxu0 }
 0xf3d   : > { %v4062_v45 = vpop.f32.mrb[55].mxu0 }
 0xf4d   : > { %2534 = vrot.lane.b32.xlu1 %v4808_v46, %s4359_s25 }
 0xf50   : > { %2488 = vrot.lane.b32.xlu0 %v4810_v47, %s4359_s25 }
 0xf6f   : > { %2259 = vadd.xlane.f32.xlu0 %v2258_v48 }
 0xf71   : > { %2262 = vadd.xlane.f32.xlu1 %v2261_v49 }
 0xf82   : > { %2682 = vrot.lane.b32.xlu1 %v4810_v47, %s4363_s8 }
 0xf86   : > { %2680 = vrot.lane.b32.xlu1 %v4822_v54, %s4363_s8 }
 0xf8a   : > { %2730 = vrot.lane.b32.xlu1 %v4824_v57, %s4363_s8 }
 0xfc7   : > { %v2470_v50 = vpop.xlane.xlu0 %2469 }
 0xfc8   : > { %v2474_v51 = vsub.f32 %v2411_v36, %v2470_v50 }
 0xfc9   : > { %v2473_v52 = vpop.xlane.xlu1 %2472 }
 0xfca   : > { %v2476_v53 = vmul.f32 1.442695, %v2474_v51  ;;  %v2475_v55 = vsub.f32 %v2462_v39, %v2473_v52 }
 0xfcb   : > { %v2489_v56 = vpop.permute.xlu0 %2488 }
 0xfcc   : > { %4265 = vpow2.f32 %v2476_v53  ;;  %v2478_v58 = vmul.f32 1.442695, %v2475_v55  ;;  %4064 = vmatpush3.bf16.msra.mxu1 %v2489_v56 }
 0xfcd   : > { %v2535_v59 = vpop.permute.xlu1 %2534  ;;  %4075 = vmatprep.subr.bf16.mxu1 %v4355_v3 }
 0xfce   : > { %4267 = vpow2.f32 %v2478_v58  ;;  %4070 = vmatpush3.bf16.msra.mxu0 %v2535_v59 }
 0xfcf   : > { %4081 = vmatprep.subr.bf16.mxu0 %v4355_v3 }
 0xfd6   : > { %v4266_v60 = vpop.eup %4265 }
 0xfd7   : > { %v2480_v62 = vsel %vm2245_vm5, %v4266_v60, 0.0  ;;  %v2486_v63 = vpack.c.bf16 %v4266_v60, %v4266_v60 }
 0xfd8   : > { %v4268_v0 = vpop.eup %4267  ;;  %2481 = vadd.xlane.f32.xlu0 %v2480_v62 }
 0xfd9   : > { %4066 = vmatmul.mubr.msk.bf16.vlgmr.msra.gmra.mrb[60].mxu1 %vm2245_vm5, %v2486_v63  ;;  %v2487_v5 = vpack.c.bf16 %v4268_v0, %v4268_v0  ;;  %v2483_v2 = vsel %vm2245_vm5, %v4268_v0, 0.0 }
 0xfda   : > { %4077 = vmatprep.mubr.msk.bf16.mxu1 %vm4356_vm1, %v4355_v3  ;;  %4076 = vmatpush3.bf16.msra.mxu1 %v2590_v6 }
 0xfdb   : > { %4072 = vmatmul.mubr.msk.bf16.vlgmr.msra.gmra.mrb[56].mxu0 %vm2245_vm5, %v2487_v5  ;;  %4087 = vmatprep.subr.bf16.mxu1 %v4355_v3 }
 0xfdc   : > { %2484 = vadd.xlane.f32.xlu0 %v2483_v2  ;;  %4082 = vmatpush3.bf16.msra.mxu0 %v2637_v1 }
 0xfdd   : > { %4083 = vmatprep.mubr.msk.bf16.mxu0 %vm4356_vm1, %v4355_v3  ;;  %4093 = vmatprep.subr.bf16.mxu0 %v4355_v3 }
 0xff2   : > { %2732 = vrot.lane.b32.xlu0 %v4808_v46, %s4363_s8 }
 0xffc   : > { %v2260_v7 = vpop.xlane.xlu0 %2259 }
 0xffd   : > { %4269 = vrcp.f32 %v2260_v7 }
 0xffe   : > { %v2263_v8 = vpop.xlane.xlu1 %2262 }
 0xfff   : > { %4271 = vrcp.f32 %v2263_v8 }
0x1002   : > { %v2683_v16 = vpop.permute.xlu1 %2682 }
0x1003   : > { %v2688_v39 = vsel %vm880_vm3, %v2683_v16, 0 }
0x1006   : > { %v2681_v21 = vpop.permute.xlu1 %2680 }
0x1007   : > { %v4270_v10 = vpop.eup %4269 }
0x1008   : > { %v2362_v14 = vmul.f32 %v4270_v10, %v4862_v26 }
0x1009   : > { %v4272_v11 = vpop.eup %4271 }
0x100a   : > { %v2363_v15 = vmul.f32 %v4272_v11, %v4864_v29  ;;  %v2731_v22 = vpop.permute.xlu1 %2730 }
0x100c   : > { %v2364_v17 = vpack.c.bf16 %v2363_v15, %v2362_v14 }
0x100e   : > { %4084 = vmatmul.mubr.msk.bf16.vlgmr.msra.gmra.mrb[60].mxu0 %vm880_vm3, %v2364_v17 }
0x100f   : > { %4095 = vmatprep.mubr.msk.bf16.mxu0 %vm4356_vm1, %v4355_v3 }
0x1065   : > { %v2482_v18 = vpop.xlane.xlu0 %2481 }
0x1066   : > { %4273 = vrcp.f32 %v2482_v18 }
0x1069   : > { %v2485_v19 = vpop.xlane.xlu0 %2484 }
0x106a   : > { %4275 = vrcp.f32 %v2485_v19 }
0x106d   : > { %v2733_v20 = vpop.permute.xlu0 %2732 }
0x106e   : > { %v2738_v9 = vsel %vm880_vm3, %v2733_v20, 0 }
0x106f   : > { %4094 = vmatpush3.bf16.xpose.msra.mxu0 %v2738_v9 }
0x1070   : > { %4105 = vmatprep.subr.bf16.mxu0 %v4355_v3  ;;  %v4274_v24 = vpop.eup %4273 }
0x1074   : > { %v4276_v13 = vpop.eup %4275 }
0x1076   : > { %4096 = vmatmul.mubr.msk.bf16.vlgmr.msra.gmra.mrb[64].mxu0 %vm880_vm3, %v2731_v22 }
0x1077   : > { %4107 = vmatprep.mubr.msk.bf16.mxu0 %vm4356_vm1, %v4355_v3 }
0x10ac   : > { %v2528_v23 = vpop.f32.mrb[60].mxu1 }
0x10ad   : > { %v4067_v26 = vpop.f32.mrb[61].mxu1  ;;  %v2582_v30 = vmul.f32 %v4274_v24, %v2528_v23 }
0x10ae   : > { %v2531_v28 = vpop.f32.mrb[62].mxu1  ;;  %v2574_v29 = vpop.f32.mrb[56].mxu0 }
0x10af   : > { %v2583_v31 = vmul.f32 %v4276_v13, %v2574_v29  ;;  %v4068_v32 = vpop.f32.mrb[63].mxu1  ;;  %v4073_v33 = vpop.f32.mrb[57].mxu0 }
0x10b0   : > { %v2577_v36 = vpop.f32.mrb[58].mxu0 }
0x10b1   : > { %v2584_v37 = vpack.c.bf16 %v2583_v31, %v2582_v30  ;;  %v4074_v38 = vpop.f32.mrb[59].mxu0 }
0x10b3   : > { %4078 = vmatmul.mubr.msk.bf16.vlgmr.msra.gmra.mrb[64].mxu1 %vm880_vm3, %v2584_v37 }
0x10b4   : > { %4088 = vmatpush3.bf16.xpose.msra.mxu1 %v2688_v39  ;;  %4089 = vmatprep.mubr.msk.bf16.mxu1 %vm4356_vm1, %v4355_v3 }
0x10b5   : > { %4099 = vmatprep.subr.bf16.mxu1 %v4355_v3 }
0x10bb   : > { %4090 = vmatmul.mubr.msk.bf16.vlgmr.msra.gmra.mrb[68].mxu1 %vm880_vm3, %v2681_v21 }
0x10bc   : > { %4101 = vmatprep.mubr.msk.bf16.mxu1 %vm4356_vm1, %v4355_v3 }
0x10e1   : > { %v2673_v40 = vpop.f32.mrb[60].mxu0 }
0x10e2   : > { %v4085_v41 = vpop.f32.mrb[61].mxu0 }
0x10e3   : > { %v2676_v42 = vpop.f32.mrb[62].mxu0 }
0x10e4   : > { %v4086_v43 = vpop.f32.mrb[63].mxu0 }
0x1149   : > { %v2774_v44 = vpop.f32.mrb[64].mxu0 }
0x114a   : > { %v4097_v45 = vpop.f32.mrb[65].mxu0  ;;  %v2783_v48 = vsel %vm2245_vm5, %v2774_v44, -inf }
0x114b   : > { %2784 = vmax.xlane.f32.xlu1 %v2783_v48  ;;  %v2777_v49 = vpop.f32.mrb[66].mxu0 }
0x114c   : > { %v4098_v50 = vpop.f32.mrb[67].mxu0 }
0x115c   : > { %2846 = vrot.lane.b32.xlu1 %v4808_v46, %s4362_s28 }
0x1186   : > { %v2626_v51 = vpop.f32.mrb[64].mxu1 }
0x1187   : > { %v4919_v52 = vadd.f32 %v2673_v40, %v2626_v51  ;;  %v4079_v53 = vpop.f32.mrb[65].mxu1 }
0x1188   : > { %v2629_v55 = vpop.f32.mrb[66].mxu1 }
0x1189   : > { %v4921_v56 = vadd.f32 %v2676_v42, %v2629_v55  ;;  %v4080_v58 = vpop.f32.mrb[67].mxu1 }
0x118e   : > { %v2724_v59 = vpop.f32.mrb[68].mxu1 }
0x118f   : > { %v4091_v60 = vpop.f32.mrb[69].mxu1  ;;  %v2780_v61 = vsel %vm2245_vm5, %v2724_v59, -inf }
0x1190   : > { %2781 = vmax.xlane.f32.xlu0 %v2780_v61  ;;  %v2727_v62 = vpop.f32.mrb[70].mxu1 }
0x1191   : > { %v4092_v63 = vpop.f32.mrb[71].mxu1 }
0x11a6   : > { %2800 = vrot.lane.b32.xlu0 %v4810_v47, %s4362_s28 }
0x11d8   : > { %v2785_v0 = vpop.xlane.xlu1 %2784 }
0x11d9   : > { %v2787_v5 = vsub.f32 %v2774_v44, %v2785_v0 }
0x11db   : > { %v2790_v1 = vmul.f32 1.442695, %v2787_v5 }
0x11dc   : > { %v2847_v2 = vpop.permute.xlu1 %2846 }
0x11dd   : > { %4277 = vpow2.f32 %v2790_v1  ;;  %4106 = vmatpush3.bf16.msra.mxu0 %v2847_v2 }
0x11de   : > { %4117 = vmatprep.subr.bf16.mxu0 %v4355_v3 }
0x11e7   : > { %v4278_v4 = vpop.eup %4277 }
0x11e8   : > { %v2795_v6 = vsel %vm2245_vm5, %v4278_v4, 0.0  ;;  %v2799_v7 = vpack.c.bf16 %v4278_v4, %v4278_v4 }
0x11e9   : > { %2796 = vadd.xlane.f32.xlu1 %v2795_v6 }
0x11ea   : > { %4108 = vmatmul.mubr.msk.bf16.vlgmr.msra.gmra.mrb[68].mxu0 %vm2245_vm5, %v2799_v7 }
0x11eb   : > { %4119 = vmatprep.mubr.msk.bf16.mxu0 %vm4356_vm1, %v4355_v3 }
0x11fa   : > { %2999 = vrot.lane.b32.xlu1 %v4808_v46, %s4366_s9 }
0x11fe   : > { %2997 = vrot.lane.b32.xlu1 %v4824_v57, %s4366_s9  ;;  %v2897_v57 = vld [vmem:[%s4510_s2 + $0x8] sm:$0xf] }
0x11ff   : > { %v2902_v16 = vsel %vm1001_vm4, %v2897_v57, 0 }
0x121d   : > { %v2782_v8 = vpop.xlane.xlu0 %2781 }
0x121e   : > { %v2786_v10 = vsub.f32 %v2724_v59, %v2782_v8 }
0x1220   : > { %v2788_v11 = vmul.f32 1.442695, %v2786_v10 }
0x1221   : > { %v2801_v14 = vpop.permute.xlu0 %2800 }
0x1222   : > { %4279 = vpow2.f32 %v2788_v11  ;;  %4100 = vmatpush3.bf16.msra.mxu1 %v2801_v14  ;;  %v3164_v11 = vld [vmem:[%s4510_s2 + $0xc] sm:$0xf] }
0x1223   : > { %4111 = vmatprep.subr.bf16.mxu1 %v4355_v3  ;;  %v3169_v14 = vsel %vm1001_vm4, %v3164_v11, 0 }
0x122c   : > { %v4280_v15 = vpop.eup %4279 }
0x122d   : > { %v2792_v17 = vsel %vm2245_vm5, %v4280_v15, 0.0  ;;  %v2798_v18 = vpack.c.bf16 %v4280_v15, %v4280_v15 }
0x122e   : > { %2793 = vadd.xlane.f32.xlu0 %v2792_v17 }
0x122f   : > { %4102 = vmatmul.mubr.msk.bf16.vlgmr.msra.gmra.mrb[72].mxu1 %vm2245_vm5, %v2798_v18 }
0x1230   : > { %4113 = vmatprep.mubr.msk.bf16.mxu1 %vm4356_vm1, %v4355_v3  ;;  %4112 = vmatpush3.bf16.msra.mxu1 %v2902_v16 }
0x1231   : > { %4123 = vmatprep.subr.bf16.mxu1 %v4355_v3 }
0x1244   : > { %2949 = vrot.lane.b32.xlu0 %v4810_v47, %s4366_s9 }
0x1248   : > { %2947 = vrot.lane.b32.xlu0 %v4822_v54, %s4366_s9 }
0x1276   : > { %v2797_v54 = vpop.xlane.xlu1 %2796 }
0x1277   : > { %4281 = vrcp.f32 %v2797_v54 }
0x127a   : > { %v3000_v33 = vpop.permute.xlu1 %2999 }
0x127b   : > { %v3005_v39 = vsel %vm880_vm3, %v3000_v33, 0 }
0x127e   : > { %v2998_v40 = vpop.permute.xlu1 %2997 }
0x1281   : > { %v4282_v13 = vpop.eup %4281 }
0x12bb   : > { %v2794_v19 = vpop.xlane.xlu0 %2793 }
0x12bc   : > { %4283 = vrcp.f32 %v2794_v19 }
0x12bd   : > { %v2886_v20 = vpop.f32.mrb[68].mxu0 }
0x12be   : > { %v4109_v9 = vpop.f32.mrb[69].mxu0  ;;  %v2895_v30 = vmul.f32 %v4282_v13, %v2886_v20 }
0x12bf   : > { %v2889_v21 = vpop.f32.mrb[70].mxu0  ;;  %v2950_v22 = vpop.permute.xlu0 %2949 }
0x12c0   : > { %v2955_v23 = vsel %vm880_vm3, %v2950_v22, 0  ;;  %v4110_v24 = vpop.f32.mrb[71].mxu0 }
0x12c1   : > { %4118 = vmatpush3.bf16.xpose.msra.mxu0 %v2955_v23 }
0x12c2   : > { %4129 = vmatprep.subr.bf16.mxu0 %v4355_v3 }
0x12c3   : > { %v2948_v26 = vpop.permute.xlu0 %2947 }
0x12c6   : > { %v4284_v28 = vpop.eup %4283 }
0x12c8   : > { %4120 = vmatmul.mubr.msk.bf16.vlgmr.msra.gmra.mrb[72].mxu0 %vm880_vm3, %v2948_v26 }
0x12c9   : > { %4131 = vmatprep.mubr.msk.bf16.mxu0 %vm4356_vm1, %v4355_v3 }
0x1302   : > { %v2840_v29 = vpop.f32.mrb[72].mxu1 }
0x1303   : > { %v2894_v31 = vmul.f32 %v4284_v28, %v2840_v29  ;;  %v4103_v32 = vpop.f32.mrb[73].mxu1  ;;  %v3764_v29 = vld [vmem:[%s5118_s20] ss:$0 sm:$0xff] }
0x1304   : > { %v2843_v36 = vpop.f32.mrb[74].mxu1 }
0x1305   : > { %v2896_v37 = vpack.c.bf16 %v2895_v30, %v2894_v31  ;;  %v4104_v38 = vpop.f32.mrb[75].mxu1 }
0x1307   : > { %4114 = vmatmul.mubr.msk.bf16.vlgmr.msra.gmra.mrb[76].mxu1 %vm880_vm3, %v2896_v37 }
0x1308   : > { %4124 = vmatpush3.bf16.xpose.msra.mxu1 %v3005_v39  ;;  %4125 = vmatprep.mubr.msk.bf16.mxu1 %vm4356_vm1, %v4355_v3 }
0x1309   : > { %4135 = vmatprep.subr.bf16.mxu1 %v4355_v3 }
0x130f   : > { %4126 = vmatmul.mubr.msk.bf16.vlgmr.msra.gmra.mrb[80].mxu1 %vm880_vm3, %v2998_v40 }
0x1310   : > { %4137 = vmatprep.mubr.msk.bf16.mxu1 %vm4356_vm1, %v4355_v3 }
0x139b   : > { %v2991_v41 = vpop.f32.mrb[72].mxu0 }
0x139c   : > { %v4121_v42 = vpop.f32.mrb[73].mxu0  ;;  %v3047_v43 = vsel %vm2245_vm5, %v2991_v41, -inf }
0x139d   : > { %3048 = vmax.xlane.f32.xlu0 %v3047_v43  ;;  %v2994_v44 = vpop.f32.mrb[74].mxu0 }
0x139e   : > { %v4122_v45 = vpop.f32.mrb[75].mxu0 }
0x13b3   : > { %3067 = vrot.lane.b32.xlu0 %v4810_v47, %s4365_s4 }
0x13da   : > { %v2938_v48 = vpop.f32.mrb[76].mxu1 }
0x13db   : > { %v4964_v49 = vadd.f32 %v2938_v48, %v4919_v52  ;;  %v4115_v50 = vpop.f32.mrb[77].mxu1 }
0x13dc   : > { %v2941_v51 = vpop.f32.mrb[78].mxu1 }
0x13dd   : > { %v4967_v53 = vadd.f32 %v2941_v51, %v4921_v56  ;;  %v4116_v55 = vpop.f32.mrb[79].mxu1 }
0x13de   : > { %v4219_v55 = vld [vmem:[%s4519_s16] sm:$0xff]  }
0x13e2   : > { %v3041_v58 = vpop.f32.mrb[80].mxu1 }
0x13e3   : > { %v4127_v59 = vpop.f32.mrb[81].mxu1  ;;  %v3050_v60 = vsel %vm2245_vm5, %v3041_v58, -inf }
0x13e4   : > { %3051 = vmax.xlane.f32.xlu1 %v3050_v60  ;;  %v3044_v61 = vpop.f32.mrb[82].mxu1  ;;  %v4221_v59 = vld [vmem:[%s4529_s0] sm:$0xff]   ;;  %v4222_v60 = vld [vmem:[%s4529_s0 + $0x8] sm:$0xff]  }
0x13e5   : > { %v4128_v62 = vpop.f32.mrb[83].mxu1 }
0x13f5   : > { %3113 = vrot.lane.b32.xlu1 %v4808_v46, %s4365_s4 }
0x142a   : > { %v3049_v47 = vpop.xlane.xlu0 %3048 }
0x142b   : > { %v3053_v63 = vsub.f32 %v2991_v41, %v3049_v47 }
0x142d   : > { %v3055_v52 = vmul.f32 1.442695, %v3053_v63 }
0x142e   : > { %v3068_v0 = vpop.permute.xlu0 %3067 }
0x142f   : > { %4285 = vpow2.f32 %v3055_v52  ;;  %4130 = vmatpush3.bf16.msra.mxu0 %v3068_v0 }
0x1430   : > { %4141 = vmatprep.subr.bf16.mxu0 %v4355_v3 }
0x1439   : > { %v4286_v56 = vpop.eup %4285 }
0x143a   : > { %v3059_v5 = vsel %vm2245_vm5, %v4286_v56, 0.0  ;;  %v3065_v1 = vpack.c.bf16 %v4286_v56, %v4286_v56  ;;  %v3253_v56 = vsub.s32 1, %v4781_v12 }
0x143b   : > { %3060 = vadd.xlane.f32.xlu0 %v3059_v5 }
0x143c   : > { %4132 = vmatmul.mubr.msk.bf16.vlgmr.msra.gmra.mrb[76].mxu0 %vm2245_vm5, %v3065_v1  ;;  %v3254_v1 = vrot.slane %v4788_v25, %v3253_v56 }
0x143d   : > { %4143 = vmatprep.mubr.msk.bf16.mxu0 %vm4356_vm1, %v4355_v3  ;;  %4142 = vmatpush3.bf16.msra.mxu0 %v3169_v14 }
0x143e   : > { %4155 = vmatprep.subr.bf16.mxu0 %v4355_v3 }
0x1471   : > { %v3052_v46 = vpop.xlane.xlu1 %3051 }
0x1472   : > { %v3054_v2 = vsub.f32 %v3041_v58, %v3052_v46  ;;  %v4220_v58 = vld [vmem:[%s4519_s16 + $0x8] sm:$0xff]  }
0x1474   : > { %v3057_v4 = vmul.f32 1.442695, %v3054_v2 }
0x1475   : > { %v3114_v6 = vpop.permute.xlu1 %3113 }
0x1476   : > { %4287 = vpow2.f32 %v3057_v4  ;;  %4136 = vmatpush3.bf16.msra.mxu1 %v3114_v6 }
0x1477   : > { %4147 = vmatprep.subr.bf16.mxu1 %v4355_v3 }
0x1480   : > { %v4288_v7 = vpop.eup %4287 }
0x1481   : > { %v3062_v8 = vsel %vm2245_vm5, %v4288_v7, 0.0  ;;  %v3066_v10 = vpack.c.bf16 %v4288_v7, %v4288_v7  ;;  %v3260_v7 = vrot.slane %v4796_v27, %v3253_v56 }
0x1482   : > { %3063 = vadd.xlane.f32.xlu1 %v3062_v8 }
0x1483   : > { %4138 = vmatmul.mubr.msk.bf16.vlgmr.msra.gmra.mrb[84].mxu1 %vm2245_vm5, %v3066_v10 }
0x1484   : > { %4151 = vmatprep.mubr.msk.bf16.mxu1 %vm4356_vm1, %v4355_v3  ;;  %4148 = vmatpush3.bf16.msra.mxu1 %v4219_v55  ;;  %v3448_v55 = vsub.s32 2, %v4781_v12 }
0x1485   : > { %4149 = vmatprep.subr.bf16.mxu1 %v4355_v3 }
0x1488   : > { %4150 = vmatpush3.bf16.msra.mxu1 %v4220_v58  ;;  %v3449_v58 = vrot.slane %v4788_v25, %v3448_v55 }
0x14c8   : > { %v3061_v16 = vpop.xlane.xlu0 %3060 }
0x14c9   : > { %4289 = vrcp.f32 %v3061_v16 }
0x14d3   : > { %v4290_v20 = vpop.eup %4289 }
0x150f   : > { %v3107_v15 = vpop.f32.mrb[76].mxu0  ;;  %v3064_v19 = vpop.xlane.xlu1 %3063 }
0x1510   : > { %v4133_v17 = vpop.f32.mrb[77].mxu0  ;;  %4291 = vrcp.f32 %v3064_v19  ;;  %v3161_v22 = vmul.f32 %v4290_v20, %v3107_v15  ;;  %v4223_v15 = vld [vmem:[%s4529_s0 + $0x10] sm:$0xff]  }
0x1511   : > { %v3110_v18 = vpop.f32.mrb[78].mxu0  ;;  %v4224_v17 = vld [vmem:[%s4529_s0 + $0x18] sm:$0xff]   ;;  %s3469_s0 = sshll.u32 %s4368_s26, 4  ;;  %s3470_s0 = int_to_ptr.vmem [resolvable:$true] %s3469_s0 }
0x1512   : > { %v4134_v57 = vpop.f32.mrb[79].mxu0  ;;  %v3765_v18 = vld [vmem:[%s770_s6] ss:$0 sm:$0xff]  ;;  %s5119_s6 = sld [smem:[#allocation7_spill]]  ;;  %s4301_s4 = scalar_lea.vmem %s3470_s0, 256 }
0x1513   : > { %p4302_p7 = scmp.ne.s32.totalorder %s3470_s0, %s4301_s4  ;;  %p4308_p10 = scmp.lt.s32.totalorder %s3470_s0, %s3470_s0 }
0x1514   : > { %p4309_p11 = scmp.lt.s32.totalorder %s4301_s4, %s4301_s4 }
0x1516   : > { %p4310_p12 = por %p4309_p11, %p4308_p10 }
0x151a   : > { %v4292_v9 = vpop.eup %4291 }
0x1556   : > { %v3153_v21 = vpop.f32.mrb[84].mxu1 }
0x1557   : > { %v3162_v23 = vmul.f32 %v4292_v9, %v3153_v21  ;;  %v4139_v24 = vpop.f32.mrb[85].mxu1 }
0x1558   : > { %v3156_v26 = vpop.f32.mrb[86].mxu1 }
0x1559   : > { %v3163_v54 = vpack.c.bf16 %v3162_v23, %v3161_v22  ;;  %v4140_v13 = vpop.f32.mrb[87].mxu1 }
0x155b   : > { %4144 = vmatmul.mubr.msk.bf16.vlgmr.msra.gmra.mrb[80].mxu0 %vm880_vm3, %v3163_v54 }
0x155c   : > { %4163 = vmatprep.mubr.msk.bf16.mxu0 %vm4356_vm1, %v4355_v3  ;;  %4156 = vmatpush3.bf16.msra.mxu0 %v4221_v59 }
0x155d   : > { %4157 = vmatprep.subr.bf16.mxu0 %v4355_v3 }
0x1560   : > { %4158 = vmatpush3.bf16.msra.mxu0 %v4222_v60 }
0x1561   : > { %4159 = vmatprep.subr.bf16.mxu0 %v4355_v3 }
0x1564   : > { %4160 = vmatpush3.bf16.msra.mxu0 %v4223_v15 }
0x1565   : > { %4161 = vmatprep.subr.bf16.mxu0 %v4355_v3  ;;  %v3769_v3 = vld [vmem:[%s778_s19] ss:$0 sm:$0xff]  ;;  %s5120_s19 = sadd.s32 4294967295, %s5119_s6  }
0x1566   : > { %p5034_p6 = scmp.eq.s32.totalorder %s5120_s19, 1 }
0x1568   : > { %4162 = vmatpush3.bf16.msra.mxu0 %v4224_v17  ;;  %p4303_p8 = pnand %p4302_p7, %p5034_p6 }
0x156a   : > { %p4304_p9 = pneg %p4303_p8 }
0x156c   : > { %p4311_p13 = pnand %p4310_p12, %p4304_p9 }
0x162e   : > { %v3205_v28 = vpop.f32.mrb[80].mxu0 }
0x162f   : > { %v3212_v30 = vadd.f32 %v3205_v28, %v4964_v49  ;;  %v4145_v31 = vpop.f32.mrb[81].mxu0 }
0x1630   : > { %v3208_v32 = vpop.f32.mrb[82].mxu0 }
0x1631   : > { %v3221_v33 = vadd.f32 %v3764_v29, %v3212_v30  ;;  %v3213_v36 = vadd.f32 %v3208_v32, %v4967_v53  ;;  %v4146_v37 = vpop.f32.mrb[83].mxu0 }
0x1633   : > { %v3222_v38 = vadd.f32 %v3764_v29, %v3213_v36  ;;  %v3223_v39 = vadd.f32 %v3221_v33, %v4799_v34 }
0x1635   : > { %v3225_v40 = vsel %vm830_vm2, %v3223_v39, 0.0  ;;  %v3224_v41 = vadd.f32 %v3222_v38, %v4801_v35 }
0x1636   : > { %3226 = vadd.xlane.f32.xlu0 %v3225_v40 }
0x1637   : > { %v3228_v42 = vsel %vm830_vm2, %v3224_v41, 0.0 }
0x163a   : > { %3229 = vadd.xlane.f32.xlu0 %v3228_v42 }
0x16c3   : > { %v3227_v43 = vpop.xlane.xlu0 %3226 }
0x16c4   : > { %v3231_v44 = vmul.f32 0.03125, %v3227_v43 }
0x16c6   : > { %v3233_v45 = vsub.f32 %v3223_v39, %v3231_v44 }
0x16c7   : > { %v3230_v48 = vpop.xlane.xlu0 %3229 }
0x16c8   : > { %v3232_v49 = vmul.f32 0.03125, %v3230_v48  ;;  %v3235_v50 = vmul.f32 %v3233_v45, %v3233_v45 }
0x16ca   : > { %v3234_v51 = vsub.f32 %v3224_v41, %v3232_v49  ;;  %v3237_v34 = vsel %vm830_vm2, %v3235_v50, 0.0 }
0x16cb   : > { %3238 = vadd.xlane.f32.xlu1 %v3237_v34 }
0x16cc   : > { %v3236_v53 = vmul.f32 %v3234_v51, %v3234_v51 }
0x16ce   : > { %v3240_v35 = vsel %vm830_vm2, %v3236_v53, 0.0 }
0x16cf   : > { %3241 = vadd.xlane.f32.xlu0 %v3240_v35 }
0x1758   : > { %v3239_v61 = vpop.xlane.xlu1 %3238 }
0x1759   : > { %v3243_v62 = vmul.f32 0.03125, %v3239_v61  ;;  %v3455_v61 = vrot.slane %v4796_v27, %v3448_v55 }
0x175b   : > { %v3245_v47 = vadd.f32 1e-05, %v3243_v62 }
0x175c   : > { %v3242_v63 = vpop.xlane.xlu0 %3241 }
0x175d   : > { %4293 = vrsqrt.f32 %v3245_v47  ;;  %v3244_v52 = vmul.f32 0.03125, %v3242_v63 }
0x175f   : > { %v3246_v0 = vadd.f32 1e-05, %v3244_v52 }
0x1761   : > { %4295 = vrsqrt.f32 %v3246_v0 }
0x1767   : > { %v4294_v5 = vpop.eup %4293 }
0x1768   : > { %v3249_v46 = vmul.f32 %v4294_v5, %v3233_v45 }
0x176a   : > { %v3255_v4 = vmul.f32 %v3254_v1, %v3249_v46 }
0x176b   : > { %v4296_v2 = vpop.eup %4295 }
0x176c   : > { %v3250_v6 = vmul.f32 %v4296_v2, %v3234_v51  ;;  %v3261_v10 = vadd.f32 %v3260_v7, %v3255_v4 }
0x176e   : > { %v3256_v8 = vmul.f32 %v3254_v1, %v3250_v6 }
0x1770   : > { %v3262_v11 = vadd.f32 %v3260_v7, %v3256_v8 }
0x1772   : > { %v3263_v14 = vpack.c.bf16 %v3262_v11, %v3261_v10 }
0x1774   : > { %4152 = vmatmul.mubr.msk.bf16.vlgmr.msra.gmra.mrb[88].mxu1 %vm830_vm2, %v3263_v14 }
0x1847   : > { %v3324_v57 = vpop.f32.mrb[88].mxu1 }
0x1848   : > { %v3325_v16 = vadd.f32 %v3765_v18, %v3324_v57  ;;  %v4153_v19 = vpop.f32.mrb[89].mxu1 }
0x1849   : > { %v3327_v20 = vpop.f32.mrb[90].mxu1 }
0x184a   : > { %v3328_v9 = vadd.f32 %v3765_v18, %v3327_v20  ;;  %v4154_v21 = vpop.f32.mrb[91].mxu1  ;;  %v3331_v22 = vmax.f32 %v3325_v16, 0.0 }
0x184c   : > { %v3332_v23 = vmax.f32 %v3328_v9, 0.0 }
0x184e   : > { %v3333_v24 = vpack.c.bf16 %v3332_v23, %v3331_v22 }
0x1850   : > { %4164 = vmatmul.mubr.msk.bf16.vlgmr.msra.gmra.mrb[84].mxu0 %vm3373_vm6, %v3333_v24 }
0x1923   : > { %v3411_v26 = vpop.f32.mrb[84].mxu0 }
0x1924   : > { %v3412_v54 = vadd.f32 %v3769_v3, %v3411_v26  ;;  %v4165_v13 = vpop.f32.mrb[85].mxu0 }
0x1925   : > { %v3414_v28 = vpop.f32.mrb[86].mxu0 }
0x1926   : > { %v3415_v29 = vadd.f32 %v3769_v3, %v3414_v28  ;;  %v4166_v30 = vpop.f32.mrb[87].mxu0  ;;  %v3418_v31 = vadd.f32 %v3412_v54, %v3261_v10 }
0x1928   : > { %v3420_v32 = vsel %vm830_vm2, %v3418_v31, 0.0  ;;  %v3419_v33 = vadd.f32 %v3415_v29, %v3262_v11 }
0x1929   : > { %3421 = vadd.xlane.f32.xlu1 %v3420_v32 }
0x192a   : > { %v3423_v36 = vsel %vm830_vm2, %v3419_v33, 0.0 }
0x192b   : > { %3424 = vadd.xlane.f32.xlu0 %v3423_v36 }
0x19b6   : > { %v3422_v37 = vpop.xlane.xlu1 %3421 }
0x19b7   : > { %v3426_v38 = vmul.f32 0.03125, %v3422_v37 }
0x19b8   : > { %v3425_v39 = vpop.xlane.xlu0 %3424 }
0x19b9   : > { %v3428_v40 = vsub.f32 %v3418_v31, %v3426_v38  ;;  %v3427_v41 = vmul.f32 0.03125, %v3425_v39 }
0x19bb   : > { %v3429_v42 = vsub.f32 %v3419_v33, %v3427_v41  ;;  %v3430_v43 = vmul.f32 %v3428_v40, %v3428_v40 }
0x19bd   : > { %v3432_v44 = vsel %vm830_vm2, %v3430_v43, 0.0  ;;  %v3431_v45 = vmul.f32 %v3429_v42, %v3429_v42 }
0x19be   : > { %3433 = vadd.xlane.f32.xlu1 %v3432_v44 }
0x19bf   : > { %v3435_v48 = vsel %vm830_vm2, %v3431_v45, 0.0 }
0x19c0   : > { %3436 = vadd.xlane.f32.xlu0 %v3435_v48 }
0x1a4b   : > { %v3434_v49 = vpop.xlane.xlu1 %3433 }
0x1a4c   : > { %v3438_v50 = vmul.f32 0.03125, %v3434_v49 }
0x1a4d   : > { %v3437_v51 = vpop.xlane.xlu0 %3436 }
0x1a4e   : > { %v3440_v34 = vadd.f32 1e-05, %v3438_v50  ;;  %v3439_v53 = vmul.f32 0.03125, %v3437_v51 }
0x1a50   : > { %4297 = vrsqrt.f32 %v3440_v34  ;;  %v3441_v35 = vadd.f32 1e-05, %v3439_v53 }
0x1a52   : > { %4299 = vrsqrt.f32 %v3441_v35 }
0x1a5a   : > { %v4298_v59 = vpop.eup %4297 }
0x1a5b   : > { %v3444_v60 = vmul.f32 %v4298_v59, %v3428_v40 }
0x1a5c   : > { %v4300_v62 = vpop.eup %4299 }
0x1a5d   : > { %v3450_v47 = vmul.f32 %v3449_v58, %v3444_v60  ;;  %v3445_v63 = vmul.f32 %v4300_v62, %v3429_v42 }
0x1a5f   : > { %v3451_v52 = vmul.f32 %v3449_v58, %v3445_v63  ;;  %v3456_v0 = vadd.f32 %v3455_v61, %v3450_v47 }
0x1a61   : > { %v3457_v12 = vadd.f32 %v3455_v61, %v3451_v52  ;;  %3458 = vst.msk [vmem:[#allocation2] sm:$0xff] %vm830_vm2, %v3456_v0 }
0x1a63   : > { %3459 = vst.msk [vmem:[#allocation2 + $0x8] sm:$0xff] %vm830_vm2, %v3457_v12 }
0x1a64   : > { %4314 = shalt.err (!%p4311_p13)
}
0x1a65   : > { %s5122_s22 = sld [smem:[#allocation16_spill]] }
0x1a6b   : > { %s5123_s30 = smov %s5122_s22  ;;  %s4315_s21 = scalar_lea.hbm %s5122_s22, 256 }
0x1a6c   : > { %p4316_p0 = scmp.ne.s32.totalorder %s5123_s30, %s4315_s21  ;;  %p4321_p3 = scmp.lt.u32.totalorder %s4315_s21, %s5123_s30 }
0x1a6e   : > { %p4317_p1 = pnand %p4316_p0, %p5034_p6 }
0x1a70   : > { %p4318_p2 = pneg %p4317_p1 }
0x1a72   : > { %p4323_p4 = pnand %p4321_p3, %p4318_p2 }
0x1a74   : > { %4326 = shalt.err (!%p4323_p4)
}
0x1a75   : > { %s4369_s20 = smov 128   ;;  %s4370_s16 = smov 8  }
0x1a76   : > { %4168 = dma.vmem_to_hbm [thread:$0]  (%p5034_p6), %s3470_s0, 256, %s5123_s30, [#allocation3], %s4369_s20, %s4369_s20, %s4370_s16  }
0x1a77   : > { %4340 = dma.done.wait (%p5034_p6), [#allocation3], 256  }
0x1a78   : > { %4342 = vsyncadd (%p5034_p6), [#allocation3], 4294967040 }
0x1a79 PF: > { %s5124_s28 = sld [smem:[#allocation7_spill]]  ;;  %s5125_s21 = sld [smem:[#allocation6_spill]] }
0x1a7a   : > { %s5126_s22 = sld [smem:[#allocation8_spill]] }
0x1a7f   : > { %s27_s23 = sadd.s32 1, %s5124_s28  }
0x1a80   : > { %p24_p5 = scmp.ge.s32.totalorder %s27_s23, 4  }
0x1a82   :  { %26 = sbr.rel (!%p24_p5) target bundleno = 11 (0xb), region = 161 }
0x1a89   :  { %3485 = vsyncpa [#allocation3], 1 }
0x1a8a   :  { %3487 = vsyncpa [#allocation3 + $0x1], 1 }

</bundles_post_ra>
